<compile_context>
chip_gen: v7x
topology: tpu7x:2x2x1
jax: 0.10.0
libtpu: 0.0.40
codegen_flags: <defaults>
</compile_context>

<pallas_src>
import numpy as np
import jax
import jax.numpy as jnp
from jax import lax
from jax.experimental import pallas as pl
from jax.experimental.pallas import tpu as pltpu

EPS = 1e-5  # PyTorch BatchNorm default eps


# --------------------------- fused forward kernel ---------------------------

def _make_fused_kernel(P1, PP, OH2, P2):
    """P1: pooled conv1 spatial (7), PP: sublane-padded P1*P1 (56),
    OH2: conv2 out spatial (5), P2: pooled conv2 spatial (2)."""

    def kernel(pat1_ref, w1_ref, sh1_ref, w2_ref, sh2_ref,
               w3_ref, sh3_ref, w4_ref, b4_ref, o_ref, h1_scr):
        # ---- conv1 + BN1 + ReLU + MaxPool(2,2) ------------------------------
        # pat1_ref[0] holds, stacked along sublanes, the (PP, 9) im2col rows of
        # the conv1 output pixels of parity par = (oy%2)*2 + (ox%2) for
        # par = 0..3; the 2x2/2 max-pool is then an elementwise max over the
        # four (aligned) parity planes.
        y1 = jnp.dot(pat1_ref[0], w1_ref[...],
                     preferred_element_type=jnp.float32)            # (4*PP, C1)
        y1 = jnp.maximum(y1 + sh1_ref[...], 0.0)
        p1 = jnp.maximum(
            jnp.maximum(y1[0 * PP:1 * PP, :], y1[1 * PP:2 * PP, :]),
            jnp.maximum(y1[2 * PP:3 * PP, :], y1[3 * PP:4 * PP, :]))
        h1_scr[...] = p1                                             # row = i*P1 + j

        # ---- conv2 + BN2 + ReLU, im2col built from VMEM ---------------------
        rows = []
        for oy in range(OH2):
            pieces = []
            for ky in range(3):
                for kx in range(3):
                    r = (oy + ky) * P1 + kx
                    pieces.append(h1_scr[r:r + OH2, :])              # (OH2, C1)
            rows.append(jnp.concatenate(pieces, axis=1))             # (OH2, 9*C1)
        lhs2 = jnp.concatenate(rows, axis=0).astype(jnp.bfloat16)    # (OH2*OH2, 9*C1)
        y2 = jnp.dot(lhs2, w2_ref[...],
                     preferred_element_type=jnp.float32)             # (OH2*OH2, C2)
        y2 = jnp.maximum(y2 + sh2_ref[...], 0.0)                     # row = oy*OH2 + ox

        # ---- MaxPool(2,2) (floor mode) + flatten (h, w, c-on-lanes) ---------
        flat_pieces = []
        for i2 in range(P2):
            for j2 in range(P2):
                r00 = (2 * i2) * OH2 + 2 * j2
                r10 = (2 * i2 + 1) * OH2 + 2 * j2
                m = jnp.maximum(
                    jnp.maximum(y2[r00:r00 + 1, :], y2[r00 + 1:r00 + 2, :]),
                    jnp.maximum(y2[r10:r10 + 1, :], y2[r10 + 1:r10 + 2, :]))
                flat_pieces.append(m)                                # (1, C2)
        flat = jnp.concatenate(flat_pieces, axis=1)                  # (1, P2*P2*C2)

        # ---- fc1 + BN3 + ReLU + fc2 -----------------------------------------
        h = jnp.dot(flat.astype(jnp.bfloat16), w3_ref[...],
                    preferred_element_type=jnp.float32)              # (1, 64)
        h = jnp.maximum(h + sh3_ref[...], 0.0)
        out = jnp.dot(h, w4_ref[...],
                      preferred_element_type=jnp.float32) + b4_ref[...]
        o_ref[0] = out                                               # (1, NC)

    return kernel


def _fused_forward(pat1p, w1s, sh1, w2m, sh2, w3r, sh3, w4r, b4,
                   *, P1, PP, OH2, P2):
    B = pat1p.shape[0]
    C1 = w1s.shape[1]
    NC = w4r.shape[1]
    kernel = _make_fused_kernel(P1, PP, OH2, P2)
    out = pl.pallas_call(
        kernel,
        out_shape=jax.ShapeDtypeStruct((B, 1, NC), jnp.float32),
        grid_spec=pltpu.PrefetchScalarGridSpec(
            num_scalar_prefetch=0,
            grid=(B,),
            in_specs=[
                pl.BlockSpec((1, 4 * PP, 9), lambda b: (b, 0, 0)),
                pl.BlockSpec(w1s.shape, lambda b: (0, 0)),
                pl.BlockSpec(sh1.shape, lambda b: (0, 0)),
                pl.BlockSpec(w2m.shape, lambda b: (0, 0)),
                pl.BlockSpec(sh2.shape, lambda b: (0, 0)),
                pl.BlockSpec(w3r.shape, lambda b: (0, 0)),
                pl.BlockSpec(sh3.shape, lambda b: (0, 0)),
                pl.BlockSpec(w4r.shape, lambda b: (0, 0)),
                pl.BlockSpec(b4.shape, lambda b: (0, 0)),
            ],
            out_specs=pl.BlockSpec((1, 1, NC), lambda b: (b, 0, 0)),
            scratch_shapes=[pltpu.VMEM((PP, C1), jnp.float32)],
        ),
        compiler_params=pltpu.CompilerParams(dimension_semantics=("parallel",)),
    )(pat1p, w1s, sh1, w2m, sh2, w3r, sh3, w4r, b4)
    return out.reshape(B, NC)


# --------------------------- parameters & forward ---------------------------

def init_params(key, img_hw=16, num_classes=2):
    ks = jax.random.split(key, 20)

    def nrm(k, shape, s=0.1):
        return jax.random.normal(k, shape, jnp.float32) * s

    p = {}
    p['conv1_w'] = nrm(ks[0], (256, 1, 3, 3))
    p['conv1_b'] = nrm(ks[1], (256,))
    p['bn1_gamma'] = 1.0 + nrm(ks[2], (256,))
    p['bn1_beta'] = nrm(ks[3], (256,))
    p['bn1_mean'] = nrm(ks[4], (256,))
    p['bn1_var'] = jax.random.uniform(ks[5], (256,), jnp.float32, 0.5, 1.5)

    p['conv2_w'] = nrm(ks[6], (128, 256, 3, 3), 0.05)
    p['conv2_b'] = nrm(ks[7], (128,))
    p['bn2_gamma'] = 1.0 + nrm(ks[8], (128,))
    p['bn2_beta'] = nrm(ks[9], (128,))
    p['bn2_mean'] = nrm(ks[10], (128,))
    p['bn2_var'] = jax.random.uniform(ks[11], (128,), jnp.float32, 0.5, 1.5)

    fdim = 128 * (img_hw // 4 - 2) ** 2
    p['fc1_w'] = nrm(ks[12], (64, fdim), 0.05)
    p['fc1_b'] = nrm(ks[13], (64,))
    p['bn3_gamma'] = 1.0 + nrm(ks[14], (64,))
    p['bn3_beta'] = nrm(ks[15], (64,))
    p['bn3_mean'] = nrm(ks[16], (64,))
    p['bn3_var'] = jax.random.uniform(ks[17], (64,), jnp.float32, 0.5, 1.5)

    p['fc2_w'] = nrm(ks[18], (num_classes, 64))
    p['fc2_b'] = nrm(ks[19], (num_classes,))
    return p


def cnn_forward(x_nchw, p):
    B, _, H, W = x_nchw.shape
    x = x_nchw[:, 0].astype(jnp.float32)            # (B, H, W), Cin = 1

    OH1 = H - 2                                      # conv1 output (must be even)
    P1 = OH1 // 2                                    # pooled conv1 spatial
    OH2 = P1 - 2                                     # conv2 output
    P2 = OH2 // 2                                    # pooled conv2 spatial
    NC = p['fc2_w'].shape[0]

    P1SQ = P1 * P1
    PP = ((P1SQ + 7) // 8) * 8                       # sublane-align each parity plane

    # conv1 im2col, grouped by output-pixel parity (pool becomes max of planes)
    cols = [x[:, ky:ky + OH1, kx:kx + OH1] for ky in range(3) for kx in range(3)]
    pat1 = jnp.stack(cols, axis=-1)                  # (B, OH1, OH1, 9)
    planes = [pat1[:, py::2, px::2, :].reshape(B, P1SQ, 9)
              for py in range(2) for px in range(2)]
    if PP != P1SQ:
        planes = [jnp.pad(q, ((0, 0), (0, PP - P1SQ), (0, 0))) for q in planes]
    pat1p = jnp.concatenate(planes, axis=1)          # (B, 4*PP, 9)

    # fold eval-mode BN into weights (scale) + per-channel shift
    s1 = p['bn1_gamma'] / jnp.sqrt(p['bn1_var'] + EPS)
    w1s = p['conv1_w'].reshape(256, 9).T * s1[None, :]                    # (9, 256)
    sh1 = (p['bn1_beta'] + (p['conv1_b'] - p['bn1_mean']) * s1).reshape(1, 256)

    s2 = p['bn2_gamma'] / jnp.sqrt(p['bn2_var'] + EPS)
    w2m = (jnp.transpose(p['conv2_w'], (2, 3, 1, 0)).reshape(9 * 256, 128)
           * s2[None, :]).astype(jnp.bfloat16)                            # (2304, 128)
    sh2 = (p['bn2_beta'] + (p['conv2_b'] - p['bn2_mean']) * s2).reshape(1, 128)

    s3 = p['bn3_gamma'] / jnp.sqrt(p['bn3_var'] + EPS)
    w3 = p['fc1_w'].reshape(64, 128, P2, P2)                              # (k, c, h, w)
    w3 = jnp.transpose(w3, (0, 2, 3, 1)).reshape(64, P2 * P2 * 128)       # (k, h, w, c)
    w3r = (w3 * s3[:, None]).T.astype(jnp.bfloat16)                       # (P2*P2*128, 64)
    sh3 = (p['bn3_beta'] + (p['fc1_b'] - p['bn3_mean']) * s3).reshape(1, 64)

    w4r = jnp.transpose(p['fc2_w'])                                       # (64, NC)
    b4 = p['fc2_b'].reshape(1, NC)

    return _fused_forward(pat1p, w1s, sh1, w2m, sh2, w3r, sh3, w4r, b4,
                          P1=P1, PP=PP, OH2=OH2, P2=P2)


# --------------------------- pure-JAX reference ----------------------------

def ref_forward(x, p):
    HI = lax.Precision.HIGHEST
    dn = ('NCHW', 'OIHW', 'NCHW')

    def bn4(y, g, b, m, v):
        return ((y - m[None, :, None, None])
                * (g / jnp.sqrt(v + EPS))[None, :, None, None]
                + b[None, :, None, None])

    y = lax.conv_general_dilated(x, p['conv1_w'], (1, 1), 'VALID',
                                 dimension_numbers=dn, precision=HI)
    y = y + p['conv1_b'][None, :, None, None]
    y = jnp.maximum(bn4(y, p['bn1_gamma'], p['bn1_beta'],
                        p['bn1_mean'], p['bn1_var']), 0.0)
    y = lax.reduce_window(y, -jnp.inf, lax.max, (1, 1, 2, 2), (1, 1, 2, 2), 'VALID')

    y = lax.conv_general_dilated(y, p['conv2_w'], (1, 1), 'VALID',
                                 dimension_numbers=dn, precision=HI)
    y = y + p['conv2_b'][None, :, None, None]
    y = jnp.maximum(bn4(y, p['bn2_gamma'], p['bn2_beta'],
                        p['bn2_mean'], p['bn2_var']), 0.0)
    y = lax.reduce_window(y, -jnp.inf, lax.max, (1, 1, 2, 2), (1, 1, 2, 2), 'VALID')

    f = y.reshape(y.shape[0], -1)
    h = jnp.dot(f, p['fc1_w'].T, precision=HI) + p['fc1_b']
    h = (h - p['bn3_mean']) * (p['bn3_gamma'] / jnp.sqrt(p['bn3_var'] + EPS)) + p['bn3_beta']
    h = jnp.maximum(h, 0.0)
    return jnp.dot(h, p['fc2_w'].T, precision=HI) + p['fc2_b']


# ---------------------------------- main ------------------------------------

if __name__ == "__main__":
    key = jax.random.PRNGKey(0)
    pkey, xkey = jax.random.split(key)
    # Small shapes consistent with the module: H=W=16 -> fc1 in = 128*(16//4-2)^2 = 512
    params = init_params(pkey, img_hw=16, num_classes=2)
    x = jax.random.normal(xkey, (2, 1, 16, 16), jnp.float32)   # NCHW, like PyTorch

    fwd = jax.jit(cnn_forward)
    out = jax.block_until_ready(fwd(x, params))
    ref = jax.block_until_ready(ref_forward(x, params))

    assert out.shape == (2, 2), out.shape
    np.testing.assert_allclose(np.asarray(out), np.asarray(ref), rtol=5e-2, atol=5e-2)
    print("KERNEL_OK")
</pallas_src>

<mosaic_0001>
module attributes {stable_mosaic.version = 11 : i64} {
  func.func @kernel(%arg0: i32, %arg1: memref<1x224x9xf32, #tpu.memory_space<vmem>>, %arg2: memref<9x256xf32, #tpu.memory_space<vmem>>, %arg3: memref<1x256xf32, #tpu.memory_space<vmem>>, %arg4: memref<2304x128xbf16, #tpu.memory_space<vmem>>, %arg5: memref<1x128xf32, #tpu.memory_space<vmem>>, %arg6: memref<512x64xbf16, #tpu.memory_space<vmem>>, %arg7: memref<1x64xf32, #tpu.memory_space<vmem>>, %arg8: memref<64x2xf32, #tpu.memory_space<vmem>>, %arg9: memref<1x2xf32, #tpu.memory_space<vmem>>, %arg10: memref<1x1x2xf32, #tpu.memory_space<vmem>>, %arg11: memref<56x256xf32, #tpu.memory_space<vmem>>) attributes {dimension_semantics = [#tpu.dimension_semantics<parallel>], iteration_bounds = array<i64: 2>, scalar_prefetch = 0 : i64, scratch_operands = 1 : i64, tpu.core_type = #tpu.core_type<tc>, window_params = [{transform_indices = @transform_0, window_bounds = array<i64: 1, 224, 9>}, {pipeline_mode = #tpu.pipeline_mode<synchronous>, transform_indices = @transform_1, window_bounds = array<i64: 9, 256>}, {pipeline_mode = #tpu.pipeline_mode<synchronous>, transform_indices = @transform_2, window_bounds = array<i64: 1, 256>}, {pipeline_mode = #tpu.pipeline_mode<synchronous>, transform_indices = @transform_3, window_bounds = array<i64: 2304, 128>}, {pipeline_mode = #tpu.pipeline_mode<synchronous>, transform_indices = @transform_4, window_bounds = array<i64: 1, 128>}, {pipeline_mode = #tpu.pipeline_mode<synchronous>, transform_indices = @transform_5, window_bounds = array<i64: 512, 64>}, {pipeline_mode = #tpu.pipeline_mode<synchronous>, transform_indices = @transform_6, window_bounds = array<i64: 1, 64>}, {pipeline_mode = #tpu.pipeline_mode<synchronous>, transform_indices = @transform_7, window_bounds = array<i64: 64, 2>}, {pipeline_mode = #tpu.pipeline_mode<synchronous>, transform_indices = @transform_8, window_bounds = array<i64: 1, 2>}, {transform_indices = @transform_9, window_bounds = array<i64: 1, 1, 2>}]} {
    %c0 = arith.constant 0 : index
    %c0_0 = arith.constant 0 : index
    %c0_1 = arith.constant 0 : index
    %0 = vector.load %arg1[%c0, %c0_0, %c0_1] : memref<1x224x9xf32, #tpu.memory_space<vmem>>, vector<1x224x9xf32>
    %1 = vector.shape_cast %0 : vector<1x224x9xf32> to vector<224x9xf32>
    %c0_2 = arith.constant 0 : index
    %c0_3 = arith.constant 0 : index
    %2 = vector.load %arg2[%c0_2, %c0_3] : memref<9x256xf32, #tpu.memory_space<vmem>>, vector<9x256xf32>
    %cst = arith.constant dense<0.000000e+00> : vector<224x256xf32>
    %3 = tpu.matmul %1, %2, %cst {dimension_numbers = #tpu.dot_dimension_numbers<[1], [0], [0], [1], [0, 0, 1, 1], [], []>} : vector<224x9xf32>, vector<9x256xf32>, vector<224x256xf32> -> vector<224x256xf32>
    %c0_4 = arith.constant 0 : index
    %c0_5 = arith.constant 0 : index
    %4 = vector.load %arg3[%c0_4, %c0_5] : memref<1x256xf32, #tpu.memory_space<vmem>>, vector<1x256xf32>
    %5 = vector.broadcast %4 : vector<1x256xf32> to vector<224x256xf32>
    %6 = arith.addf %3, %5 : vector<224x256xf32>
    %cst_6 = arith.constant 0.000000e+00 : f32
    %7 = vector.broadcast %cst_6 : f32 to vector<224x256xf32>
    %8 = arith.maximumf %6, %7 : vector<224x256xf32>
    %9 = vector.extract_strided_slice %8 {offsets = [0, 0], sizes = [56, 256], strides = [1, 1]} : vector<224x256xf32> to vector<56x256xf32>
    %10 = vector.extract_strided_slice %8 {offsets = [56, 0], sizes = [56, 256], strides = [1, 1]} : vector<224x256xf32> to vector<56x256xf32>
    %11 = arith.maximumf %9, %10 : vector<56x256xf32>
    %12 = vector.extract_strided_slice %8 {offsets = [112, 0], sizes = [56, 256], strides = [1, 1]} : vector<224x256xf32> to vector<56x256xf32>
    %13 = vector.extract_strided_slice %8 {offsets = [168, 0], sizes = [56, 256], strides = [1, 1]} : vector<224x256xf32> to vector<56x256xf32>
    %14 = arith.maximumf %12, %13 : vector<56x256xf32>
    %15 = arith.maximumf %11, %14 : vector<56x256xf32>
    %c0_7 = arith.constant 0 : index
    %c0_8 = arith.constant 0 : index
    %16 = vector.load %arg11[%c0_7, %c0_8] : memref<56x256xf32, #tpu.memory_space<vmem>>, vector<56x256xf32>
    tpu.vector_store %arg11[%c0_7, %c0_8], %15 {strides = array<i32>} : memref<56x256xf32, #tpu.memory_space<vmem>>, vector<56x256xf32>,
    %c0_9 = arith.constant 0 : index
    %c0_10 = arith.constant 0 : index
    %17 = vector.load %arg11[%c0_9, %c0_10] : memref<56x256xf32, #tpu.memory_space<vmem>>, vector<5x256xf32>
    %c1 = arith.constant 1 : index
    %c0_11 = arith.constant 0 : index
    %18 = vector.load %arg11[%c1, %c0_11] : memref<56x256xf32, #tpu.memory_space<vmem>>, vector<5x256xf32>
    %c2 = arith.constant 2 : index
    %c0_12 = arith.constant 0 : index
    %19 = vector.load %arg11[%c2, %c0_12] : memref<56x256xf32, #tpu.memory_space<vmem>>, vector<5x256xf32>
    %c7 = arith.constant 7 : index
    %c0_13 = arith.constant 0 : index
    %20 = vector.load %arg11[%c7, %c0_13] : memref<56x256xf32, #tpu.memory_space<vmem>>, vector<5x256xf32>
    %c8 = arith.constant 8 : index
    %c0_14 = arith.constant 0 : index
    %21 = vector.load %arg11[%c8, %c0_14] : memref<56x256xf32, #tpu.memory_space<vmem>>, vector<5x256xf32>
    %c9 = arith.constant 9 : index
    %c0_15 = arith.constant 0 : index
    %22 = vector.load %arg11[%c9, %c0_15] : memref<56x256xf32, #tpu.memory_space<vmem>>, vector<5x256xf32>
    %c14 = arith.constant 14 : index
    %c0_16 = arith.constant 0 : index
    %23 = vector.load %arg11[%c14, %c0_16] : memref<56x256xf32, #tpu.memory_space<vmem>>, vector<5x256xf32>
    %c15 = arith.constant 15 : index
    %c0_17 = arith.constant 0 : index
    %24 = vector.load %arg11[%c15, %c0_17] : memref<56x256xf32, #tpu.memory_space<vmem>>, vector<5x256xf32>
    %c16 = arith.constant 16 : index
    %c0_18 = arith.constant 0 : index
    %25 = vector.load %arg11[%c16, %c0_18] : memref<56x256xf32, #tpu.memory_space<vmem>>, vector<5x256xf32>
    %26 = tpu.concatenate %17, %18, %19, %20, %21, %22, %23, %24, %25 in 1 : vector<5x256xf32>, vector<5x256xf32>, vector<5x256xf32>, vector<5x256xf32>, vector<5x256xf32>, vector<5x256xf32>, vector<5x256xf32>, vector<5x256xf32>, vector<5x256xf32> -> vector<5x2304xf32>
    %c7_19 = arith.constant 7 : index
    %c0_20 = arith.constant 0 : index
    %27 = vector.load %arg11[%c7_19, %c0_20] : memref<56x256xf32, #tpu.memory_space<vmem>>, vector<5x256xf32>
    %c8_21 = arith.constant 8 : index
    %c0_22 = arith.constant 0 : index
    %28 = vector.load %arg11[%c8_21, %c0_22] : memref<56x256xf32, #tpu.memory_space<vmem>>, vector<5x256xf32>
    %c9_23 = arith.constant 9 : index
    %c0_24 = arith.constant 0 : index
    %29 = vector.load %arg11[%c9_23, %c0_24] : memref<56x256xf32, #tpu.memory_space<vmem>>, vector<5x256xf32>
    %c14_25 = arith.constant 14 : index
    %c0_26 = arith.constant 0 : index
    %30 = vector.load %arg11[%c14_25, %c0_26] : memref<56x256xf32, #tpu.memory_space<vmem>>, vector<5x256xf32>
    %c15_27 = arith.constant 15 : index
    %c0_28 = arith.constant 0 : index
    %31 = vector.load %arg11[%c15_27, %c0_28] : memref<56x256xf32, #tpu.memory_space<vmem>>, vector<5x256xf32>
    %c16_29 = arith.constant 16 : index
    %c0_30 = arith.constant 0 : index
    %32 = vector.load %arg11[%c16_29, %c0_30] : memref<56x256xf32, #tpu.memory_space<vmem>>, vector<5x256xf32>
    %c21 = arith.constant 21 : index
    %c0_31 = arith.constant 0 : index
    %33 = vector.load %arg11[%c21, %c0_31] : memref<56x256xf32, #tpu.memory_space<vmem>>, vector<5x256xf32>
    %c22 = arith.constant 22 : index
    %c0_32 = arith.constant 0 : index
    %34 = vector.load %arg11[%c22, %c0_32] : memref<56x256xf32, #tpu.memory_space<vmem>>, vector<5x256xf32>
    %c23 = arith.constant 23 : index
    %c0_33 = arith.constant 0 : index
    %35 = vector.load %arg11[%c23, %c0_33] : memref<56x256xf32, #tpu.memory_space<vmem>>, vector<5x256xf32>
    %36 = tpu.concatenate %27, %28, %29, %30, %31, %32, %33, %34, %35 in 1 : vector<5x256xf32>, vector<5x256xf32>, vector<5x256xf32>, vector<5x256xf32>, vector<5x256xf32>, vector<5x256xf32>, vector<5x256xf32>, vector<5x256xf32>, vector<5x256xf32> -> vector<5x2304xf32>
    %c14_34 = arith.constant 14 : index
    %c0_35 = arith.constant 0 : index
    %37 = vector.load %arg11[%c14_34, %c0_35] : memref<56x256xf32, #tpu.memory_space<vmem>>, vector<5x256xf32>
    %c15_36 = arith.constant 15 : index
    %c0_37 = arith.constant 0 : index
    %38 = vector.load %arg11[%c15_36, %c0_37] : memref<56x256xf32, #tpu.memory_space<vmem>>, vector<5x256xf32>
    %c16_38 = arith.constant 16 : index
    %c0_39 = arith.constant 0 : index
    %39 = vector.load %arg11[%c16_38, %c0_39] : memref<56x256xf32, #tpu.memory_space<vmem>>, vector<5x256xf32>
    %c21_40 = arith.constant 21 : index
    %c0_41 = arith.constant 0 : index
    %40 = vector.load %arg11[%c21_40, %c0_41] : memref<56x256xf32, #tpu.memory_space<vmem>>, vector<5x256xf32>
    %c22_42 = arith.constant 22 : index
    %c0_43 = arith.constant 0 : index
    %41 = vector.load %arg11[%c22_42, %c0_43] : memref<56x256xf32, #tpu.memory_space<vmem>>, vector<5x256xf32>
    %c23_44 = arith.constant 23 : index
    %c0_45 = arith.constant 0 : index
    %42 = vector.load %arg11[%c23_44, %c0_45] : memref<56x256xf32, #tpu.memory_space<vmem>>, vector<5x256xf32>
    %c28 = arith.constant 28 : index
    %c0_46 = arith.constant 0 : index
    %43 = vector.load %arg11[%c28, %c0_46] : memref<56x256xf32, #tpu.memory_space<vmem>>, vector<5x256xf32>
    %c29 = arith.constant 29 : index
    %c0_47 = arith.constant 0 : index
    %44 = vector.load %arg11[%c29, %c0_47] : memref<56x256xf32, #tpu.memory_space<vmem>>, vector<5x256xf32>
    %c30 = arith.constant 30 : index
    %c0_48 = arith.constant 0 : index
    %45 = vector.load %arg11[%c30, %c0_48] : memref<56x256xf32, #tpu.memory_space<vmem>>, vector<5x256xf32>
    %46 = tpu.concatenate %37, %38, %39, %40, %41, %42, %43, %44, %45 in 1 : vector<5x256xf32>, vector<5x256xf32>, vector<5x256xf32>, vector<5x256xf32>, vector<5x256xf32>, vector<5x256xf32>, vector<5x256xf32>, vector<5x256xf32>, vector<5x256xf32> -> vector<5x2304xf32>
    %c21_49 = arith.constant 21 : index
    %c0_50 = arith.constant 0 : index
    %47 = vector.load %arg11[%c21_49, %c0_50] : memref<56x256xf32, #tpu.memory_space<vmem>>, vector<5x256xf32>
    %c22_51 = arith.constant 22 : index
    %c0_52 = arith.constant 0 : index
    %48 = vector.load %arg11[%c22_51, %c0_52] : memref<56x256xf32, #tpu.memory_space<vmem>>, vector<5x256xf32>
    %c23_53 = arith.constant 23 : index
    %c0_54 = arith.constant 0 : index
    %49 = vector.load %arg11[%c23_53, %c0_54] : memref<56x256xf32, #tpu.memory_space<vmem>>, vector<5x256xf32>
    %c28_55 = arith.constant 28 : index
    %c0_56 = arith.constant 0 : index
    %50 = vector.load %arg11[%c28_55, %c0_56] : memref<56x256xf32, #tpu.memory_space<vmem>>, vector<5x256xf32>
    %c29_57 = arith.constant 29 : index
    %c0_58 = arith.constant 0 : index
    %51 = vector.load %arg11[%c29_57, %c0_58] : memref<56x256xf32, #tpu.memory_space<vmem>>, vector<5x256xf32>
    %c30_59 = arith.constant 30 : index
    %c0_60 = arith.constant 0 : index
    %52 = vector.load %arg11[%c30_59, %c0_60] : memref<56x256xf32, #tpu.memory_space<vmem>>, vector<5x256xf32>
    %c35 = arith.constant 35 : index
    %c0_61 = arith.constant 0 : index
    %53 = vector.load %arg11[%c35, %c0_61] : memref<56x256xf32, #tpu.memory_space<vmem>>, vector<5x256xf32>
    %c36 = arith.constant 36 : index
    %c0_62 = arith.constant 0 : index
    %54 = vector.load %arg11[%c36, %c0_62] : memref<56x256xf32, #tpu.memory_space<vmem>>, vector<5x256xf32>
    %c37 = arith.constant 37 : index
    %c0_63 = arith.constant 0 : index
    %55 = vector.load %arg11[%c37, %c0_63] : memref<56x256xf32, #tpu.memory_space<vmem>>, vector<5x256xf32>
    %56 = tpu.concatenate %47, %48, %49, %50, %51, %52, %53, %54, %55 in 1 : vector<5x256xf32>, vector<5x256xf32>, vector<5x256xf32>, vector<5x256xf32>, vector<5x256xf32>, vector<5x256xf32>, vector<5x256xf32>, vector<5x256xf32>, vector<5x256xf32> -> vector<5x2304xf32>
    %c28_64 = arith.constant 28 : index
    %c0_65 = arith.constant 0 : index
    %57 = vector.load %arg11[%c28_64, %c0_65] : memref<56x256xf32, #tpu.memory_space<vmem>>, vector<5x256xf32>
    %c29_66 = arith.constant 29 : index
    %c0_67 = arith.constant 0 : index
    %58 = vector.load %arg11[%c29_66, %c0_67] : memref<56x256xf32, #tpu.memory_space<vmem>>, vector<5x256xf32>
    %c30_68 = arith.constant 30 : index
    %c0_69 = arith.constant 0 : index
    %59 = vector.load %arg11[%c30_68, %c0_69] : memref<56x256xf32, #tpu.memory_space<vmem>>, vector<5x256xf32>
    %c35_70 = arith.constant 35 : index
    %c0_71 = arith.constant 0 : index
    %60 = vector.load %arg11[%c35_70, %c0_71] : memref<56x256xf32, #tpu.memory_space<vmem>>, vector<5x256xf32>
    %c36_72 = arith.constant 36 : index
    %c0_73 = arith.constant 0 : index
    %61 = vector.load %arg11[%c36_72, %c0_73] : memref<56x256xf32, #tpu.memory_space<vmem>>, vector<5x256xf32>
    %c37_74 = arith.constant 37 : index
    %c0_75 = arith.constant 0 : index
    %62 = vector.load %arg11[%c37_74, %c0_75] : memref<56x256xf32, #tpu.memory_space<vmem>>, vector<5x256xf32>
    %c42 = arith.constant 42 : index
    %c0_76 = arith.constant 0 : index
    %63 = vector.load %arg11[%c42, %c0_76] : memref<56x256xf32, #tpu.memory_space<vmem>>, vector<5x256xf32>
    %c43 = arith.constant 43 : index
    %c0_77 = arith.constant 0 : index
    %64 = vector.load %arg11[%c43, %c0_77] : memref<56x256xf32, #tpu.memory_space<vmem>>, vector<5x256xf32>
    %c44 = arith.constant 44 : index
    %c0_78 = arith.constant 0 : index
    %65 = vector.load %arg11[%c44, %c0_78] : memref<56x256xf32, #tpu.memory_space<vmem>>, vector<5x256xf32>
    %66 = tpu.concatenate %57, %58, %59, %60, %61, %62, %63, %64, %65 in 1 : vector<5x256xf32>, vector<5x256xf32>, vector<5x256xf32>, vector<5x256xf32>, vector<5x256xf32>, vector<5x256xf32>, vector<5x256xf32>, vector<5x256xf32>, vector<5x256xf32> -> vector<5x2304xf32>
    %67 = tpu.concatenate %26, %36, %46, %56, %66 in 0 : vector<5x2304xf32>, vector<5x2304xf32>, vector<5x2304xf32>, vector<5x2304xf32>, vector<5x2304xf32> -> vector<25x2304xf32>
    %68 = arith.truncf %67 : vector<25x2304xf32> to vector<25x2304xbf16>
    %c0_79 = arith.constant 0 : index
    %c0_80 = arith.constant 0 : index
    %69 = vector.load %arg4[%c0_79, %c0_80] : memref<2304x128xbf16, #tpu.memory_space<vmem>>, vector<2304x128xbf16>
    %cst_81 = arith.constant dense<0.000000e+00> : vector<25x128xf32>
    %70 = tpu.matmul %68, %69, %cst_81 {dimension_numbers = #tpu.dot_dimension_numbers<[1], [0], [0], [1], [0, 0, 1, 1], [], []>} : vector<25x2304xbf16>, vector<2304x128xbf16>, vector<25x128xf32> -> vector<25x128xf32>
    %c0_82 = arith.constant 0 : index
    %c0_83 = arith.constant 0 : index
    %71 = vector.load %arg5[%c0_82, %c0_83] : memref<1x128xf32, #tpu.memory_space<vmem>>, vector<1x128xf32>
    %72 = vector.broadcast %71 : vector<1x128xf32> to vector<25x128xf32>
    %73 = arith.addf %70, %72 : vector<25x128xf32>
    %cst_84 = arith.constant 0.000000e+00 : f32
    %74 = vector.broadcast %cst_84 : f32 to vector<25x128xf32>
    %75 = arith.maximumf %73, %74 : vector<25x128xf32>
    %76 = vector.extract_strided_slice %75 {offsets = [0, 0], sizes = [1, 128], strides = [1, 1]} : vector<25x128xf32> to vector<1x128xf32>
    %77 = vector.extract_strided_slice %75 {offsets = [1, 0], sizes = [1, 128], strides = [1, 1]} : vector<25x128xf32> to vector<1x128xf32>
    %78 = arith.maximumf %76, %77 : vector<1x128xf32>
    %79 = vector.extract_strided_slice %75 {offsets = [5, 0], sizes = [1, 128], strides = [1, 1]} : vector<25x128xf32> to vector<1x128xf32>
    %80 = vector.extract_strided_slice %75 {offsets = [6, 0], sizes = [1, 128], strides = [1, 1]} : vector<25x128xf32> to vector<1x128xf32>
    %81 = arith.maximumf %79, %80 : vector<1x128xf32>
    %82 = arith.maximumf %78, %81 : vector<1x128xf32>
    %83 = vector.extract_strided_slice %75 {offsets = [2, 0], sizes = [1, 128], strides = [1, 1]} : vector<25x128xf32> to vector<1x128xf32>
    %84 = vector.extract_strided_slice %75 {offsets = [3, 0], sizes = [1, 128], strides = [1, 1]} : vector<25x128xf32> to vector<1x128xf32>
    %85 = arith.maximumf %83, %84 : vector<1x128xf32>
    %86 = vector.extract_strided_slice %75 {offsets = [7, 0], sizes = [1, 128], strides = [1, 1]} : vector<25x128xf32> to vector<1x128xf32>
    %87 = vector.extract_strided_slice %75 {offsets = [8, 0], sizes = [1, 128], strides = [1, 1]} : vector<25x128xf32> to vector<1x128xf32>
    %88 = arith.maximumf %86, %87 : vector<1x128xf32>
    %89 = arith.maximumf %85, %88 : vector<1x128xf32>
    %90 = vector.extract_strided_slice %75 {offsets = [10, 0], sizes = [1, 128], strides = [1, 1]} : vector<25x128xf32> to vector<1x128xf32>
    %91 = vector.extract_strided_slice %75 {offsets = [11, 0], sizes = [1, 128], strides = [1, 1]} : vector<25x128xf32> to vector<1x128xf32>
    %92 = arith.maximumf %90, %91 : vector<1x128xf32>
    %93 = vector.extract_strided_slice %75 {offsets = [15, 0], sizes = [1, 128], strides = [1, 1]} : vector<25x128xf32> to vector<1x128xf32>
    %94 = vector.extract_strided_slice %75 {offsets = [16, 0], sizes = [1, 128], strides = [1, 1]} : vector<25x128xf32> to vector<1x128xf32>
    %95 = arith.maximumf %93, %94 : vector<1x128xf32>
    %96 = arith.maximumf %92, %95 : vector<1x128xf32>
    %97 = vector.extract_strided_slice %75 {offsets = [12, 0], sizes = [1, 128], strides = [1, 1]} : vector<25x128xf32> to vector<1x128xf32>
    %98 = vector.extract_strided_slice %75 {offsets = [13, 0], sizes = [1, 128], strides = [1, 1]} : vector<25x128xf32> to vector<1x128xf32>
    %99 = arith.maximumf %97, %98 : vector<1x128xf32>
    %100 = vector.extract_strided_slice %75 {offsets = [17, 0], sizes = [1, 128], strides = [1, 1]} : vector<25x128xf32> to vector<1x128xf32>
    %101 = vector.extract_strided_slice %75 {offsets = [18, 0], sizes = [1, 128], strides = [1, 1]} : vector<25x128xf32> to vector<1x128xf32>
    %102 = arith.maximumf %100, %101 : vector<1x128xf32>
    %103 = arith.maximumf %99, %102 : vector<1x128xf32>
    %104 = tpu.concatenate %82, %89, %96, %103 in 1 : vector<1x128xf32>, vector<1x128xf32>, vector<1x128xf32>, vector<1x128xf32> -> vector<1x512xf32>
    %105 = arith.truncf %104 : vector<1x512xf32> to vector<1x512xbf16>
    %c0_85 = arith.constant 0 : index
    %c0_86 = arith.constant 0 : index
    %106 = vector.load %arg6[%c0_85, %c0_86] : memref<512x64xbf16, #tpu.memory_space<vmem>>, vector<512x64xbf16>
    %cst_87 = arith.constant dense<0.000000e+00> : vector<1x64xf32>
    %107 = tpu.matmul %105, %106, %cst_87 {dimension_numbers = #tpu.dot_dimension_numbers<[1], [0], [0], [1], [0, 0, 1, 1], [], []>} : vector<1x512xbf16>, vector<512x64xbf16>, vector<1x64xf32> -> vector<1x64xf32>
    %c0_88 = arith.constant 0 : index
    %c0_89 = arith.constant 0 : index
    %108 = vector.load %arg7[%c0_88, %c0_89] : memref<1x64xf32, #tpu.memory_space<vmem>>, vector<1x64xf32>
    %109 = arith.addf %107, %108 : vector<1x64xf32>
    %cst_90 = arith.constant 0.000000e+00 : f32
    %110 = vector.broadcast %cst_90 : f32 to vector<1x64xf32>
    %111 = arith.maximumf %109, %110 : vector<1x64xf32>
    %c0_91 = arith.constant 0 : index
    %c0_92 = arith.constant 0 : index
    %112 = vector.load %arg8[%c0_91, %c0_92] : memref<64x2xf32, #tpu.memory_space<vmem>>, vector<64x2xf32>
    %cst_93 = arith.constant dense<0.000000e+00> : vector<1x2xf32>
    %113 = tpu.matmul %111, %112, %cst_93 {dimension_numbers = #tpu.dot_dimension_numbers<[1], [0], [0], [1], [0, 0, 1, 1], [], []>} : vector<1x64xf32>, vector<64x2xf32>, vector<1x2xf32> -> vector<1x2xf32>
    %c0_94 = arith.constant 0 : index
    %c0_95 = arith.constant 0 : index
    %114 = vector.load %arg9[%c0_94, %c0_95] : memref<1x2xf32, #tpu.memory_space<vmem>>, vector<1x2xf32>
    %115 = arith.addf %113, %114 : vector<1x2xf32>
    %c0_96 = arith.constant 0 : index
    %c0_97 = arith.constant 0 : index
    %c0_98 = arith.constant 0 : index
    %116 = vector.load %arg10[%c0_96, %c0_97, %c0_98] : memref<1x1x2xf32, #tpu.memory_space<vmem>>, vector<1x1x2xf32>
    %117 = vector.shape_cast %116 : vector<1x1x2xf32> to vector<1x2xf32>
    %118 = vector.shape_cast %115 : vector<1x2xf32> to vector<1x1x2xf32>
    tpu.vector_store %arg10[%c0_96, %c0_97, %c0_98], %118 {strides = array<i32>} : memref<1x1x2xf32, #tpu.memory_space<vmem>>, vector<1x1x2xf32>,
    return
  }
  func.func @transform_0(%arg0: i32) -> (i32, i32, i32) {
    %c0_i32 = arith.constant 0 : i32
    %c0_i32_0 = arith.constant 0 : i32
    %c0_i32_1 = arith.constant 0 : i32
    return %arg0, %c0_i32, %c0_i32_0 : i32, i32, i32
  }
  func.func @transform_1(%arg0: i32) -> (i32, i32) {
    %c0_i32 = arith.constant 0 : i32
    %c0_i32_0 = arith.constant 0 : i32
    %c0_i32_1 = arith.constant 0 : i32
    return %c0_i32, %c0_i32_0 : i32, i32
  }
  func.func @transform_2(%arg0: i32) -> (i32, i32) {
    %c0_i32 = arith.constant 0 : i32
    %c0_i32_0 = arith.constant 0 : i32
    %c0_i32_1 = arith.constant 0 : i32
    return %c0_i32, %c0_i32_0 : i32, i32
  }
  func.func @transform_3(%arg0: i32) -> (i32, i32) {
    %c0_i32 = arith.constant 0 : i32
    %c0_i32_0 = arith.constant 0 : i32
    %c0_i32_1 = arith.constant 0 : i32
    return %c0_i32, %c0_i32_0 : i32, i32
  }
  func.func @transform_4(%arg0: i32) -> (i32, i32) {
    %c0_i32 = arith.constant 0 : i32
    %c0_i32_0 = arith.constant 0 : i32
    %c0_i32_1 = arith.constant 0 : i32
    return %c0_i32, %c0_i32_0 : i32, i32
  }
  func.func @transform_5(%arg0: i32) -> (i32, i32) {
    %c0_i32 = arith.constant 0 : i32
    %c0_i32_0 = arith.constant 0 : i32
    %c0_i32_1 = arith.constant 0 : i32
    return %c0_i32, %c0_i32_0 : i32, i32
  }
  func.func @transform_6(%arg0: i32) -> (i32, i32) {
    %c0_i32 = arith.constant 0 : i32
    %c0_i32_0 = arith.constant 0 : i32
    %c0_i32_1 = arith.constant 0 : i32
    return %c0_i32, %c0_i32_0 : i32, i32
  }
  func.func @transform_7(%arg0: i32) -> (i32, i32) {
    %c0_i32 = arith.constant 0 : i32
    %c0_i32_0 = arith.constant 0 : i32
    %c0_i32_1 = arith.constant 0 : i32
    return %c0_i32, %c0_i32_0 : i32, i32
  }
  func.func @transform_8(%arg0: i32) -> (i32, i32) {
    %c0_i32 = arith.constant 0 : i32
    %c0_i32_0 = arith.constant 0 : i32
    %c0_i32_1 = arith.constant 0 : i32
    return %c0_i32, %c0_i32_0 : i32, i32
  }
  func.func @transform_9(%arg0: i32) -> (i32, i32, i32) {
    %c0_i32 = arith.constant 0 : i32
    %c0_i32_0 = arith.constant 0 : i32
    %c0_i32_1 = arith.constant 0 : i32
    return %arg0, %c0_i32, %c0_i32_0 : i32, i32, i32
  }
}

</mosaic_0001>

<bundles_post_ra>
// kernel: cnn_forward.1
= control target key start
LH: loop header
LB: loop body
LE: loop exit
PB: predicated region body
PF: predicated region fallthrough
CT: control target
= control target key end

     0   :  { %14 = vsyncpa [#allocation4], 0  ;;  %s5992_s0 = inlined_call_operand.vmem [shape: f32[2,224,9], index: 0, kind: input, shape index: {}]   ;;  %s5993_s1 = inlined_call_operand.vmem [shape: f32[9,256], index: 1, kind: input, shape index: {}]   ;;  %s5994_s2 = inlined_call_operand.vmem [shape: f32[1,256], index: 2, kind: input, shape index: {}]   ;;  %s5995_s3 = inlined_call_operand.vmem [shape: bf16[2304,128], index: 3, kind: input, shape index: {}]   ;;  %s5996_s4 = inlined_call_operand.vmem [shape: f32[1,128], index: 4, kind: input, shape index: {}]   ;;  %s5997_s5 = inlined_call_operand.vmem [shape: bf16[512,64], index: 5, kind: input, shape index: {}]   ;;  %s5998_s6 = inlined_call_operand.vmem [shape: f32[1,64], index: 6, kind: input, shape index: {}]   ;;  %s5999_s7 = inlined_call_operand.vmem [shape: f32[64,2], index: 7, kind: input, shape index: {}]   ;;  %s6000_s8 = inlined_call_operand.vmem [shape: f32[1,2], index: 8, kind: input, shape index: {}]   ;;  %s6001_s9 = inlined_call_operand.hbm [shape: f32[2,1,2], index: 9, kind: output, shape index: {}]  }
   0x1   :  { %16 = vsyncpa [#allocation4 + $0x1], 0  ;;  %s4476_s30 = smov 0   ;;  %s4478_s10 = smov 0  }
   0x2   :  { %s4480_s11 = smov 0   ;;  %s4482_s12 = smov 0  }
   0x3 LB: > { %s4497_s13 = sadd.s32 4294967295, %s4419_s12   ;;  %s3575_s14 = sadd.s32 4294967294, %s4419_s12   ;;  %s4419_s12 = sphi %s4482_s12, %s6052_s12   ;;  %s4415_s11 = sphi %s4480_s11, %s6051_s11   ;;  %s4411_s10 = sphi %s4478_s10, %s6050_s10   ;;  %s4407_s30 = sphi %s4476_s30, %s6049_s30  }
   0x4   : > { %s4501_s15 = sadd.s32 1, %s4419_s12   ;;  %s223_s16 = sadd.s32 1, %s4415_s11 }
   0x5   : > { %s220_s17 = ssub.s32 %s4419_s12, %s4501_s15  ;;  %p233_p0 = scmp.ne.s32.totalorder %s4415_s11, %s4411_s10 }
   0x6   : > { %p221_p1 = scmp.eq.s32.totalorder %s220_s17, 0  ;;  %p234_p2 = scmp.eq.s32.totalorder %s4497_s13, 1 }
   0x7   : > { %p239_p3 = scmp.ne.s32.totalorder %s4411_s10, %s4407_s30  ;;  %p240_p4 = scmp.eq.s32.totalorder %s3575_s14, 1 }
   0x8   : > { %s4512_s18 = scalar_select %p221_p1, %s4415_s11, %s223_s16  }
   0x9   : > { %p4514_p5 = por %p234_p2, %p233_p0  ;;  %p4518_p6 = por %p240_p4, %p239_p3 }
   0xa   : > { %p3578_p7 = scmp.ge.s32.totalorder %s4419_s12, 1  ;;  %p290_p8 = scmp.lt.s32.totalorder %s4419_s12, 3 }
   0xc   : > { %p291_p9 = pnand %p3578_p7, %p290_p8 }
   0xe   : > { %294 = sbr.rel (%p291_p9) target bundleno = 1213 (0x4bd), region = 56 }
  0x15   : > { %v360_v0 = vld [vmem:[%s5993_s1 + $0x8] sm:$0xff]  ;;  %v362_v1 = vld [vmem:[%s5993_s1 + $0x18] sm:$0x1]  ;;  %vm460_vm0 = vcmask 1040384   ;;  %v359_v2 = vld [vmem:[%s5993_s1] sm:$0xff]  ;;  %vm4421_vm1 = vmmov 1  }
  0x16   : > { %v4117_v3 = vpack.c.bf16 %v362_v1, %v360_v0  ;;  %vm4118_vm2 = vmpackc.low %vm460_vm0, %vm4421_vm1  ;;  %v361_v4 = vld [vmem:[%s5993_s1 + $0x10] sm:$0x1]  ;;  %p325_p10 = scmp.lt.s32.totalorder %s4497_s13, 1  ;;  %v6002_v6 = vmov 0.0   ;;  %vm375_vm3 = vcmask 72704   ;;  %v4179_v35 = vld [vmem:[%s5995_s3 + $0x40] sm:$0xff]  }
  0x17   : > { %v4120_v5 = vpack.c.bf16 %v361_v4, %v359_v2  ;;  %531 = vmatprep.mubr.f32.mxu0 %v6002_v6  ;;  %v4180_v36 = vld [vmem:[%s5995_s3] sm:$0xff]   ;;  %3793 = vmatprep.subr.bf16.mxu1 %v4179_v35  ;;  %v4181_v37 = vld [vmem:[%s5995_s3 + $0x48] sm:$0xff]   ;;  %v4184_v40 = vld [vmem:[%s5995_s3 + $0x50] sm:$0xff]   ;;  %vm1012_vm4 = vcmask 1045504   ;;  %vm1338_vm5 = vcmask 1044480   ;;  %vm1185_vm6 = vcmask 1043456  }
  0x18   : > { %4119 = vmatprep.subr.msk.bf16.mxu0 %vm4118_vm2, %v4117_v3  ;;  %s326_s29 = scalar_select %p325_p10, %s4497_s13, 1  ;;  %3794 = vmatpush3.bf16.msra.mxu1 %v4180_v36  ;;  %v4182_v38 = vld [vmem:[%s5995_s3 + $0x8] sm:$0xff]   ;;  %v4183_v39 = vld [vmem:[%s5995_s3 + $0x1c0] sm:$0xff]   ;;  %v4186_v42 = vld [vmem:[%s5995_s3 + $0x10] sm:$0xff]   ;;  %vm870_vm7 = vcmask 1041408   ;;  %vm951_vm8 = vcmask 1046528  }
  0x19   : > { %4122 = vmatpush1.bf16.msk.msra.mxu0 %vm4118_vm2, %v4120_v5  ;;  %3795 = vmatprep.subr.bf16.mxu1 %v4181_v37  ;;  %v4185_v41 = vld [vmem:[%s5995_s3 + $0x180] sm:$0xff]   ;;  %v4187_v43 = vld [vmem:[%s5995_s3 + $0x1c8] sm:$0xff]   ;;  %v4188_v44 = vld [vmem:[%s5995_s3 + $0x58] sm:$0xff]   ;;  %vm4424_vm9 = vmmov 0   ;;  %vm3431_vm10 = vcmask 523264   ;;  %s323_s24 = sand.u32 1, %s4411_s10  }
  0x1a   : > { %s4135_s14 = smul.u32 224, %s326_s29  ;;  %3877 = vmatprep.subr.bf16.mxu0 %v4183_v39  ;;  %v4189_v45 = vld [vmem:[%s5995_s3 + $0x188] sm:$0xff]   ;;  %v4190_v46 = vld [vmem:[%s5995_s3 + $0x18] sm:$0xff]   ;;  %v4191_v47 = vld [vmem:[%s5995_s3 + $0x1d0] sm:$0xff]   ;;  %s3790_s27 = sshll.u32 %s4497_s13, 4  ;;  %vm3505_vm11 = vcmask 8192  }
  0x1b   : > { %v4192_v48 = vld [vmem:[%s5995_s3 + $0x60] sm:$0xff]   ;;  %v4193_v49 = vld [vmem:[%s5995_s3 + $0x190] sm:$0xff]   ;;  %v4195_v51 = vld [vmem:[%s5995_s3 + $0x1d8] sm:$0xff]   ;;  %s324_s28 = scalar_lea.vmem [#allocation3], %s323_s24  ;;  %s5950_s17 = scalar_lea.hbm %s6001_s9, %s3790_s27 }
  0x1c   : > { %s4543_s21 = scalar_lea.vmem %s5992_s0, %s4135_s14  ;;  %3796 = vmatpush3.bf16.msra.mxu1 %v4182_v38  ;;  %v4194_v50 = vld [vmem:[%s5995_s3 + $0x20] sm:$0xff]   ;;  %v4196_v52 = vld [vmem:[%s5995_s3 + $0x68] sm:$0xff]   ;;  %v4197_v53 = vld [vmem:[%s5995_s3 + $0x198] sm:$0xff]   ;;  %s3520_s29 = sshll.u32 %s324_s28, 4  ;;  %s5952_s29 = int_to_ptr.vmem [resolvable:$true] %s3520_s29 }
  0x1d   : > { %v331_v7 = vld [vmem:[%s4543_s21] sm:$0xff]  ;;  %v332_v8 = vld [vmem:[%s4543_s21 + $0x8] sm:$0xff]  ;;  %v333_v9 = vld [vmem:[%s4543_s21 + $0x10] sm:$0xff]  ;;  %3797 = vmatprep.subr.bf16.mxu1 %v4184_v40  ;;  %s4357_s22 = scalar_lea.vmem %s5952_s29, 16  ;;  %s4425_s13 = smov [#allocation3]  }
  0x1e   : > { %3582 = vmatmul.mubr.msk.f32.vlgmr.msra.gmra.mrb[0].mxu0 %vm375_vm3, %v331_v7  ;;  %v334_v10 = vld [vmem:[%s4543_s21 + $0x18] sm:$0xff]  ;;  %v335_v11 = vld [vmem:[%s4543_s21 + $0x20] sm:$0xff]  ;;  %v336_v12 = vld [vmem:[%s4543_s21 + $0x28] sm:$0xff]  ;;  %p4358_p11 = scmp.ne.s32.totalorder %s5952_s29, %s4357_s22  ;;  %s4361_s23 = sshll.u32 %s4425_s13, 4  ;;  %s4362_s23 = int_to_ptr.vmem [resolvable:$false] %s4361_s23 }
  0x1f   : > { %537 = vmatprep.mubr.f32.mxu0 %v6002_v6  ;;  %v337_v13 = vld [vmem:[%s4543_s21 + $0x30] sm:$0xff]  ;;  %v338_v14 = vld [vmem:[%s4543_s21 + $0x38] sm:$0xff]  ;;  %v339_v15 = vld [vmem:[%s4543_s21 + $0x40] sm:$0xff]  ;;  %3878 = vmatpush3.bf16.msra.mxu0 %v4185_v41  ;;  %s4363_s25 = scalar_lea.vmem %s4362_s23, 32  ;;  %p4364_p0 = scmp.lt.s32.totalorder %s5952_s29, %s4362_s23 }
  0x20   : > { %v340_v16 = vld [vmem:[%s4543_s21 + $0x48] sm:$0xff]  ;;  %v341_v17 = vld [vmem:[%s4543_s21 + $0x50] sm:$0xff]  ;;  %v342_v18 = vld [vmem:[%s4543_s21 + $0x58] sm:$0xff]  ;;  %3798 = vmatpush3.bf16.msra.mxu1 %v4186_v42  ;;  %3879 = vmatprep.subr.bf16.mxu0 %v4187_v43  ;;  %p4359_p12 = pnand %p4358_p11, %p4514_p5  ;;  %p4365_p1 = scmp.lt.s32.totalorder %s4363_s25, %s4357_s22 }
  0x21   : > { %v343_v19 = vld [vmem:[%s4543_s21 + $0x60] sm:$0xff]  ;;  %v344_v20 = vld [vmem:[%s4543_s21 + $0x68] sm:$0xff]  ;;  %v345_v21 = vld [vmem:[%s4543_s21 + $0x70] sm:$0xff]  ;;  %3799 = vmatprep.subr.bf16.mxu1 %v4188_v44 }
  0x22   : > { %3583 = vmatmul.mubr.msk.f32.gmra.mrb[2].mxu0 %vm375_vm3, %v332_v8  ;;  %v346_v22 = vld [vmem:[%s4543_s21 + $0x78] sm:$0xff]  ;;  %v347_v23 = vld [vmem:[%s4543_s21 + $0x80] sm:$0xff]  ;;  %v348_v24 = vld [vmem:[%s4543_s21 + $0x88] sm:$0xff]  ;;  %p4360_p13 = pneg %p4359_p12  ;;  %p4366_p2 = por %p4365_p1, %p4364_p0 }
  0x23   : > { %543 = vmatprep.mubr.f32.mxu0 %v6002_v6  ;;  %v349_v25 = vld [vmem:[%s4543_s21 + $0x90] sm:$0xff]  ;;  %v350_v26 = vld [vmem:[%s4543_s21 + $0x98] sm:$0xff]  ;;  %v351_v27 = vld [vmem:[%s4543_s21 + $0xa0] sm:$0xff]  ;;  %3880 = vmatpush3.bf16.msra.mxu0 %v4189_v45 }
  0x24   : > { %v352_v28 = vld [vmem:[%s4543_s21 + $0xa8] sm:$0xff]  ;;  %v353_v29 = vld [vmem:[%s4543_s21 + $0xb0] sm:$0xff]  ;;  %v354_v30 = vld [vmem:[%s4543_s21 + $0xb8] sm:$0xff]  ;;  %3800 = vmatpush3.bf16.msra.mxu1 %v4190_v46  ;;  %3881 = vmatprep.subr.bf16.mxu0 %v4191_v47  ;;  %p4367_p3 = pnand %p4366_p2, %p4360_p13 }
  0x25   : > { %v355_v31 = vld [vmem:[%s4543_s21 + $0xc0] sm:$0xff]  ;;  %v356_v32 = vld [vmem:[%s4543_s21 + $0xc8] sm:$0xff]  ;;  %v357_v33 = vld [vmem:[%s4543_s21 + $0xd0] sm:$0xff]  ;;  %3801 = vmatprep.subr.bf16.mxu1 %v4192_v48 }
  0x26   : > { %3584 = vmatmul.mubr.msk.f32.gmra.mrb[4].mxu0 %vm375_vm3, %v333_v9  ;;  %v358_v34 = vld [vmem:[%s4543_s21 + $0xd8] sm:$0xff]  ;;  %v4198_v54 = vld [vmem:[%s5995_s3 + $0x28] sm:$0xff]   ;;  %v4199_v55 = vld [vmem:[%s5995_s3 + $0x1e0] sm:$0xff]   ;;  %s3508_s21 = scalar_lea.sflag [#allocation4], %s323_s24 }
  0x27   : > { %549 = vmatprep.mubr.f32.mxu0 %v6002_v6  ;;  %3882 = vmatpush3.bf16.msra.mxu0 %v4193_v49  ;;  %v4200_v56 = vld [vmem:[%s5995_s3 + $0x70] sm:$0xff]   ;;  %v4201_v57 = vld [vmem:[%s5995_s3 + $0x1a0] sm:$0xff]   ;;  %v4203_v59 = vld [vmem:[%s5995_s3 + $0x1e8] sm:$0xff]  }
  0x28   : > { %3802 = vmatpush3.bf16.msra.mxu1 %v4194_v50  ;;  %3883 = vmatprep.subr.bf16.mxu0 %v4195_v51  ;;  %v4202_v58 = vld [vmem:[%s5995_s3 + $0x30] sm:$0xff]   ;;  %v4204_v60 = vld [vmem:[%s5995_s3 + $0x78] sm:$0xff]   ;;  %v4205_v61 = vld [vmem:[%s5995_s3 + $0x1a8] sm:$0xff]  }
  0x29   : > { %3803 = vmatprep.subr.bf16.mxu1 %v4196_v52  ;;  %v4206_v62 = vld [vmem:[%s5995_s3 + $0x38] sm:$0xff]   ;;  %v4207_v63 = vld [vmem:[%s5995_s3 + $0x1f0] sm:$0xff]   ;;  %v4208_v0 = vld [vmem:[%s5995_s3 + $0xc0] sm:$0xff]  }
  0x2a   : > { %3585 = vmatmul.mubr.msk.f32.gmra.mrb[6].mxu0 %vm375_vm3, %v334_v10  ;;  %v4209_v1 = vld [vmem:[%s5995_s3 + $0x1b0] sm:$0xff]   ;;  %v4211_v2 = vld [vmem:[%s5995_s3 + $0x1f8] sm:$0xff]   ;;  %v4215_v7 = vld [vmem:[%s5995_s3 + $0x2c0] sm:$0xff]  }
  0x2b   : > { %555 = vmatprep.mubr.f32.mxu0 %v6002_v6  ;;  %3884 = vmatpush3.bf16.msra.mxu0 %v4197_v53  ;;  %v4213_v3 = vld [vmem:[%s5995_s3 + $0x1b8] sm:$0xff]  }
  0x2c   : > { %3804 = vmatpush3.bf16.msra.mxu1 %v4198_v54  ;;  %3885 = vmatprep.subr.bf16.mxu0 %v4199_v55 }
  0x2d   : > { %3805 = vmatprep.subr.bf16.mxu1 %v4200_v56 }
  0x2e   : > { %3586 = vmatmul.mubr.msk.f32.gmra.mrb[8].mxu0 %vm375_vm3, %v335_v11 }
  0x2f   : > { %561 = vmatprep.mubr.f32.mxu0 %v6002_v6  ;;  %3886 = vmatpush3.bf16.msra.mxu0 %v4201_v57 }
  0x30   : > { %3806 = vmatpush3.bf16.msra.mxu1 %v4202_v58  ;;  %3887 = vmatprep.subr.bf16.mxu0 %v4203_v59 }
  0x31   : > { %3807 = vmatprep.subr.bf16.mxu1 %v4204_v60 }
  0x32   : > { %3587 = vmatmul.mubr.msk.f32.gmra.mrb[10].mxu0 %vm375_vm3, %v336_v12  ;;  %v365_v12 = vlaneseq }
  0x33   : > { %567 = vmatprep.mubr.f32.mxu0 %v6002_v6  ;;  %3888 = vmatpush3.bf16.msra.mxu0 %v4205_v61 }
  0x34   : > { %3808 = vmatpush3.bf16.msra.mxu1 %v4206_v62  ;;  %3889 = vmatprep.subr.bf16.mxu0 %v4207_v63 }
  0x35   : > { %3821 = vmatprep.subr.bf16.mxu1 %v4208_v0 }
  0x36   : > { %3588 = vmatmul.mubr.msk.f32.gmra.mrb[12].mxu0 %vm375_vm3, %v337_v13 }
  0x37   : > { %573 = vmatprep.mubr.f32.mxu0 %v6002_v6  ;;  %3890 = vmatpush3.bf16.msra.mxu0 %v4209_v1 }
  0x38   : > { %3891 = vmatprep.subr.bf16.mxu0 %v4211_v2 }
  0x3a   : > { %3589 = vmatmul.mubr.msk.f32.gmra.mrb[14].mxu0 %vm375_vm3, %v338_v14 }
  0x3b   : > { %579 = vmatprep.mubr.f32.mxu0 %v6002_v6  ;;  %3892 = vmatpush3.bf16.msra.mxu0 %v4213_v3 }
  0x3c   : > { %3933 = vmatprep.subr.bf16.mxu0 %v4215_v7 }
  0x3e   : > { %3590 = vmatmul.mubr.msk.f32.gmra.mrb[16].mxu0 %vm375_vm3, %v339_v15  ;;  %v366_v15 = vshrl.u32 %v365_v12, 7 }
  0x3f   : > { %585 = vmatprep.mubr.f32.mxu0 %v6002_v6 }
  0x42   : > { %3591 = vmatmul.mubr.msk.f32.gmra.mrb[18].mxu0 %vm375_vm3, %v340_v16 }
  0x43   : > { %591 = vmatprep.mubr.f32.mxu0 %v6002_v6 }
  0x46   : > { %3592 = vmatmul.mubr.msk.f32.gmra.mrb[20].mxu0 %vm375_vm3, %v341_v17 }
  0x47   : > { %597 = vmatprep.mubr.f32.mxu0 %v6002_v6 }
  0x4a   : > { %3593 = vmatmul.mubr.msk.f32.gmra.mrb[22].mxu0 %vm375_vm3, %v342_v18  ;;  %v367_v18 = vsub.s32 0, %v366_v15 }
  0x4b   : > { %603 = vmatprep.mubr.f32.mxu0 %v6002_v6 }
  0x4e   : > { %3594 = vmatmul.mubr.msk.f32.gmra.mrb[24].mxu0 %vm375_vm3, %v343_v19  ;;  %v363_v19 = vld [vmem:[%s5994_s2] sm:$0x3] }
  0x4f   : > { %609 = vmatprep.mubr.f32.mxu0 %v6002_v6 }
  0x52   : > { %3595 = vmatmul.mubr.msk.f32.gmra.mrb[26].mxu0 %vm375_vm3, %v344_v20  ;;  %v371_v20 = vsub.s32 1, %v366_v15 }
  0x53   : > { %615 = vmatprep.mubr.f32.mxu0 %v6002_v6 }
  0x56   : > { %3596 = vmatmul.mubr.msk.f32.gmra.mrb[28].mxu0 %vm375_vm3, %v345_v21 }
  0x57   : > { %621 = vmatprep.mubr.f32.mxu0 %v6002_v6 }
  0x5a   : > { %3597 = vmatmul.mubr.msk.f32.gmra.mrb[30].mxu0 %vm375_vm3, %v346_v22 }
  0x5b   : > { %627 = vmatprep.mubr.f32.mxu0 %v6002_v6 }
  0x5e   : > { %3598 = vmatmul.mubr.msk.f32.gmra.mrb[32].mxu0 %vm375_vm3, %v347_v23  ;;  %v4735_v23 = vrot.slane %v363_v19, %v367_v18 }
  0x5f   : > { %633 = vmatprep.mubr.f32.mxu0 %v6002_v6 }
  0x62   : > { %3599 = vmatmul.mubr.msk.f32.gmra.mrb[34].mxu0 %vm375_vm3, %v348_v24  ;;  %v4737_v24 = vrot.slane %v363_v19, %v371_v20 }
  0x63   : > { %639 = vmatprep.mubr.f32.mxu0 %v6002_v6 }
  0x66   : > { %3600 = vmatmul.mubr.msk.f32.gmra.mrb[36].mxu0 %vm375_vm3, %v349_v25 }
  0x67   : > { %645 = vmatprep.mubr.f32.mxu0 %v6002_v6 }
  0x6a   : > { %3601 = vmatmul.mubr.msk.f32.gmra.mrb[38].mxu0 %vm375_vm3, %v350_v26 }
  0x6b   : > { %651 = vmatprep.mubr.f32.mxu0 %v6002_v6 }
  0x6e   : > { %3602 = vmatmul.mubr.msk.f32.gmra.mrb[40].mxu0 %vm375_vm3, %v351_v27 }
  0x6f   : > { %657 = vmatprep.mubr.f32.mxu0 %v6002_v6 }
  0x72   : > { %3603 = vmatmul.mubr.msk.f32.gmra.mrb[42].mxu0 %vm375_vm3, %v352_v28 }
  0x73   : > { %663 = vmatprep.mubr.f32.mxu0 %v6002_v6 }
  0x76   : > { %3604 = vmatmul.mubr.msk.f32.gmra.mrb[44].mxu0 %vm375_vm3, %v353_v29 }
  0x77   : > { %669 = vmatprep.mubr.f32.mxu0 %v6002_v6 }
  0x7a   : > { %3605 = vmatmul.mubr.msk.f32.gmra.mrb[46].mxu0 %vm375_vm3, %v354_v30 }
  0x7b   : > { %675 = vmatprep.mubr.f32.mxu0 %v6002_v6 }
  0x7e   : > { %3606 = vmatmul.mubr.msk.f32.gmra.mrb[48].mxu0 %vm375_vm3, %v355_v31 }
  0x7f   : > { %681 = vmatprep.mubr.f32.mxu0 %v6002_v6 }
  0x82   : > { %3607 = vmatmul.mubr.msk.f32.gmra.mrb[50].mxu0 %vm375_vm3, %v356_v32 }
  0x83   : > { %687 = vmatprep.mubr.f32.mxu0 %v6002_v6 }
  0x86   : > { %3608 = vmatmul.mubr.msk.f32.gmra.mrb[52].mxu0 %vm375_vm3, %v357_v33 }
  0x87   : > { %693 = vmatprep.mubr.f32.mxu0 %v6002_v6 }
  0x8a   : > { %3609 = vmatmul.mubr.msk.f32.gmra.mrb[54].mxu0 %vm375_vm3, %v358_v34 }
  0xf1   : > { %v533_v4 = vpop.f32.mrb[0].mxu0 }
  0xf2   : > { %v535_v5 = vpop.f32.mrb[1].mxu0  ;;  %v534_v27 = vadd.f32 %v533_v4, %v4735_v23 }
  0xf3   : > { %v536_v28 = vadd.f32 %v535_v5, %v4737_v24 }
  0xf4   : > { %v700_v33 = vmax.f32 %v534_v27, 0.0 }
  0xf5   : > { %v539_v8 = vpop.f32.mrb[2].mxu0  ;;  %v701_v36 = vmax.f32 %v536_v28, 0.0 }
  0xf6   : > { %v541_v9 = vpop.f32.mrb[3].mxu0  ;;  %v540_v34 = vadd.f32 %v539_v8, %v4735_v23 }
  0xf7   : > { %v542_v37 = vadd.f32 %v541_v9, %v4737_v24 }
  0xf8   : > { %v702_v45 = vmax.f32 %v540_v34, 0.0 }
  0xf9   : > { %v545_v10 = vpop.f32.mrb[4].mxu0  ;;  %v703_v48 = vmax.f32 %v542_v37, 0.0 }
  0xfa   : > { %v547_v11 = vpop.f32.mrb[5].mxu0  ;;  %v546_v46 = vadd.f32 %v545_v10, %v4735_v23 }
  0xfb   : > { %v548_v49 = vadd.f32 %v547_v11, %v4737_v24 }
  0xfc   : > { %v704_v57 = vmax.f32 %v546_v46, 0.0 }
  0xfd   : > { %v551_v13 = vpop.f32.mrb[6].mxu0  ;;  %v705_v60 = vmax.f32 %v548_v49, 0.0 }
  0xfe   : > { %v553_v14 = vpop.f32.mrb[7].mxu0  ;;  %v552_v58 = vadd.f32 %v551_v13, %v4735_v23 }
  0xff   : > { %v554_v61 = vadd.f32 %v553_v14, %v4737_v24 }
 0x100   : > { %v706_v5 = vmax.f32 %v552_v58, 0.0 }
 0x101   : > { %v557_v16 = vpop.f32.mrb[8].mxu0  ;;  %v707_v9 = vmax.f32 %v554_v61, 0.0 }
 0x102   : > { %v559_v17 = vpop.f32.mrb[9].mxu0  ;;  %v558_v7 = vadd.f32 %v557_v16, %v4735_v23 }
 0x103   : > { %v560_v10 = vadd.f32 %v559_v17, %v4737_v24 }
 0x104   : > { %v708_v20 = vmax.f32 %v558_v7, 0.0 }
 0x105   : > { %v563_v21 = vpop.f32.mrb[10].mxu0  ;;  %v709_v16 = vmax.f32 %v560_v10, 0.0 }
 0x106   : > { %v4733_v22 = vpop.f32.mrb[11].mxu0  ;;  %v564_v27 = vadd.f32 %v563_v21, %v4735_v23 }
 0x109   : > { %v4739_v25 = vpop.f32.mrb[12].mxu0 }
 0x10a   : > { %v4741_v26 = vpop.f32.mrb[13].mxu0  ;;  %v570_v21 = vadd.f32 %v4739_v25, %v4735_v23 }
 0x10d   : > { %v575_v29 = vpop.f32.mrb[14].mxu0 }
 0x10e   : > { %v576_v30 = vadd.f32 %v575_v29, %v4735_v23  ;;  %v577_v31 = vpop.f32.mrb[15].mxu0  ;;  %v566_v29 = vadd.f32 %v4733_v22, %v4737_v24  ;;  %v572_v22 = vadd.f32 %v4741_v26, %v4737_v24 }
 0x10f   : > { %v578_v32 = vadd.f32 %v577_v31, %v4737_v24 }
 0x110   : > { %v714_v35 = vmax.f32 %v576_v30, 0.0 }
 0x111   : > { %v715_v38 = vmax.f32 %v578_v32, 0.0  ;;  %v581_v39 = vpop.f32.mrb[16].mxu0 }
 0x112   : > { %v4749_v40 = vmax.f32 %v700_v33, %v714_v35  ;;  %v582_v41 = vadd.f32 %v581_v39, %v4735_v23  ;;  %v583_v42 = vpop.f32.mrb[17].mxu0 }
 0x113   : > { %v4752_v43 = vmax.f32 %v701_v36, %v715_v38  ;;  %v584_v44 = vadd.f32 %v583_v42, %v4737_v24  ;;  %v710_v36 = vmax.f32 %v564_v27, 0.0  ;;  %v711_v38 = vmax.f32 %v566_v29, 0.0 }
 0x114   : > { %v716_v47 = vmax.f32 %v582_v41, 0.0 }
 0x115   : > { %v717_v50 = vmax.f32 %v584_v44, 0.0  ;;  %v587_v51 = vpop.f32.mrb[18].mxu0 }
 0x116   : > { %v4757_v52 = vmax.f32 %v702_v45, %v716_v47  ;;  %v588_v53 = vadd.f32 %v587_v51, %v4735_v23  ;;  %v589_v54 = vpop.f32.mrb[19].mxu0 }
 0x117   : > { %v4760_v55 = vmax.f32 %v703_v48, %v717_v50  ;;  %v590_v56 = vadd.f32 %v589_v54, %v4737_v24  ;;  %v712_v48 = vmax.f32 %v570_v21, 0.0  ;;  %v713_v50 = vmax.f32 %v572_v22, 0.0 }
 0x118   : > { %v718_v59 = vmax.f32 %v588_v53, 0.0 }
 0x119   : > { %v719_v62 = vmax.f32 %v590_v56, 0.0  ;;  %v593_v63 = vpop.f32.mrb[20].mxu0 }
 0x11a   : > { %v4765_v0 = vmax.f32 %v704_v57, %v718_v59  ;;  %v594_v1 = vadd.f32 %v593_v63, %v4735_v23  ;;  %v595_v2 = vpop.f32.mrb[21].mxu0 }
 0x11b   : > { %v4768_v3 = vmax.f32 %v705_v60, %v719_v62  ;;  %v596_v4 = vadd.f32 %v595_v2, %v4737_v24 }
 0x11c   : > { %v720_v8 = vmax.f32 %v594_v1, 0.0 }
 0x11d   : > { %v721_v11 = vmax.f32 %v596_v4, 0.0  ;;  %v599_v12 = vpop.f32.mrb[22].mxu0 }
 0x11e   : > { %v4773_v13 = vmax.f32 %v706_v5, %v720_v8  ;;  %v600_v14 = vadd.f32 %v599_v12, %v4735_v23  ;;  %v601_v15 = vpop.f32.mrb[23].mxu0 }
 0x11f   : > { %v4776_v18 = vmax.f32 %v707_v9, %v721_v11  ;;  %v602_v19 = vadd.f32 %v601_v15, %v4737_v24 }
 0x120   : > { %v722_v28 = vmax.f32 %v600_v14, 0.0 }
 0x121   : > { %v723_v17 = vmax.f32 %v602_v19, 0.0  ;;  %v605_v30 = vpop.f32.mrb[24].mxu0 }
 0x122   : > { %v4782_v31 = vmax.f32 %v708_v20, %v722_v28  ;;  %v606_v32 = vadd.f32 %v605_v30, %v4735_v23  ;;  %v607_v33 = vpop.f32.mrb[25].mxu0 }
 0x123   : > { %v4785_v34 = vmax.f32 %v709_v16, %v723_v17  ;;  %v608_v35 = vadd.f32 %v607_v33, %v4737_v24 }
 0x124   : > { %v724_v37 = vmax.f32 %v606_v32, 0.0 }
 0x125   : > { %v725_v39 = vmax.f32 %v608_v35, 0.0  ;;  %v611_v41 = vpop.f32.mrb[26].mxu0 }
 0x126   : > { %v4792_v42 = vmax.f32 %v710_v36, %v724_v37  ;;  %v612_v44 = vadd.f32 %v611_v41, %v4735_v23  ;;  %v613_v45 = vpop.f32.mrb[27].mxu0 }
 0x127   : > { %v4795_v46 = vmax.f32 %v711_v38, %v725_v39  ;;  %v614_v47 = vadd.f32 %v613_v45, %v4737_v24 }
 0x128   : > { %v726_v49 = vmax.f32 %v612_v44, 0.0 }
 0x129   : > { %v727_v25 = vmax.f32 %v614_v47, 0.0  ;;  %v617_v51 = vpop.f32.mrb[28].mxu0 }
 0x12a   : > { %v4798_v53 = vmax.f32 %v712_v48, %v726_v49  ;;  %v619_v54 = vpop.f32.mrb[29].mxu0  ;;  %v618_v7 = vadd.f32 %v617_v51, %v4735_v23 }
 0x12b   : > { %v4800_v26 = vmax.f32 %v713_v50, %v727_v25  ;;  %v620_v8 = vadd.f32 %v619_v54, %v4737_v24 }
 0x12c   : > { %v728_v14 = vmax.f32 %v618_v7, 0.0 }
 0x12d   : > { %v623_v56 = vpop.f32.mrb[30].mxu0  ;;  %v729_v20 = vmax.f32 %v620_v8, 0.0 }
 0x12e   : > { %v625_v57 = vpop.f32.mrb[31].mxu0  ;;  %v624_v15 = vadd.f32 %v623_v56, %v4735_v23 }
 0x12f   : > { %v626_v27 = vadd.f32 %v625_v57, %v4737_v24 }
 0x130   : > { %v730_v35 = vmax.f32 %v624_v15, 0.0 }
 0x131   : > { %v629_v58 = vpop.f32.mrb[32].mxu0  ;;  %v731_v38 = vmax.f32 %v626_v27, 0.0 }
 0x132   : > { %v631_v59 = vpop.f32.mrb[33].mxu0  ;;  %v630_v36 = vadd.f32 %v629_v58, %v4735_v23 }
 0x133   : > { %v632_v22 = vadd.f32 %v631_v59, %v4737_v24 }
 0x135   : > { %v635_v60 = vpop.f32.mrb[34].mxu0 }
 0x136   : > { %v637_v61 = vpop.f32.mrb[35].mxu0  ;;  %v636_v49 = vadd.f32 %v635_v60, %v4735_v23 }
 0x137   : > { %v638_v51 = vadd.f32 %v637_v61, %v4737_v24 }
 0x139   : > { %v641_v62 = vpop.f32.mrb[36].mxu0  ;;  %v735_v61 = vmax.f32 %v638_v51, 0.0 }
 0x13a   : > { %v643_v63 = vpop.f32.mrb[37].mxu0 }
 0x13d   : > { %v647_v1 = vpop.f32.mrb[38].mxu0 }
 0x13e   : > { %v4802_v2 = vpop.f32.mrb[39].mxu0  ;;  %v648_v15 = vadd.f32 %v647_v1, %v4735_v23 }
 0x141   : > { %v4804_v4 = vpop.f32.mrb[40].mxu0 }
 0x142   : > { %v4806_v5 = vpop.f32.mrb[41].mxu0 }
 0x143   : > { %v4843_v1 = vadd.f32 %v4806_v5, %v4737_v24 }
 0x145   : > { %v659_v9 = vpop.f32.mrb[42].mxu0 }
 0x146   : > { %v660_v10 = vadd.f32 %v659_v9, %v4735_v23  ;;  %v661_v11 = vpop.f32.mrb[43].mxu0  ;;  %v734_v9 = vmax.f32 %v636_v49, 0.0 }
 0x147   : > { %v662_v12 = vadd.f32 %v661_v11, %v4737_v24 }
 0x148   : > { %v742_v19 = vmax.f32 %v660_v10, 0.0 }
 0x149   : > { %v743_v28 = vmax.f32 %v662_v12, 0.0  ;;  %v665_v16 = vpop.f32.mrb[44].mxu0 }
 0x14a   : > { %v770_v29 = vmax.f32 %v728_v14, %v742_v19  ;;  %v666_v17 = vadd.f32 %v665_v16, %v4735_v23  ;;  %v667_v30 = vpop.f32.mrb[45].mxu0 }
 0x14b   : > { %v771_v32 = vmax.f32 %v729_v20, %v743_v28  ;;  %v668_v33 = vadd.f32 %v667_v30, %v4737_v24  ;;  %v650_v28 = vadd.f32 %v4802_v2, %v4737_v24 }
 0x14c   : > { %v784_v21 = vmax.f32 %v4749_v40, %v770_v29  ;;  %v744_v37 = vmax.f32 %v666_v17, 0.0  ;;  %v732_v40 = vmax.f32 %v630_v36, 0.0 }
 0x14d   : > { %v785_v39 = vmax.f32 %v4752_v43, %v771_v32  ;;  %v745_v41 = vmax.f32 %v668_v33, 0.0  ;;  %v671_v44 = vpop.f32.mrb[46].mxu0  ;;  %v733_v43 = vmax.f32 %v632_v22, 0.0  ;;  %v738_v33 = vmax.f32 %v648_v15, 0.0 }
 0x14e   : > { %798 = vst [vmem:[#allocation2] sm:$0xff] %v784_v21  ;;  %v772_v45 = vmax.f32 %v730_v35, %v744_v37  ;;  %v672_v47 = vadd.f32 %v671_v44, %v4735_v23  ;;  %v673_v48 = vpop.f32.mrb[47].mxu0  ;;  %v739_v37 = vmax.f32 %v650_v28, 0.0 }
 0x14f   : > { %799 = vst [vmem:[#allocation2 + $0x8] sm:$0xff] %v785_v39  ;;  %v773_v50 = vmax.f32 %v731_v38, %v745_v41  ;;  %v674_v25 = vadd.f32 %v673_v48, %v4737_v24 }
 0x150   : > { %v786_v54 = vmax.f32 %v4757_v52, %v772_v45  ;;  %v746_v56 = vmax.f32 %v672_v47, 0.0  ;;  %v642_v52 = vadd.f32 %v641_v62, %v4735_v23  ;;  %v741_v47 = vmax.f32 %v4843_v1, 0.0 }
 0x151   : > { %v787_v57 = vmax.f32 %v4760_v55, %v773_v50  ;;  %v747_v58 = vmax.f32 %v674_v25, 0.0  ;;  %v677_v59 = vpop.f32.mrb[48].mxu0  ;;  %v644_v55 = vadd.f32 %v643_v63, %v4737_v24 }
 0x152   : > { %800 = vst [vmem:[#allocation2 + $0x10] sm:$0xff] %v786_v54  ;;  %v774_v7 = vmax.f32 %v732_v40, %v746_v56  ;;  %v678_v8 = vadd.f32 %v677_v59, %v4735_v23  ;;  %v679_v60 = vpop.f32.mrb[49].mxu0 }
 0x153   : > { %801 = vst [vmem:[#allocation2 + $0x18] sm:$0xff] %v787_v57  ;;  %v775_v10 = vmax.f32 %v733_v43, %v747_v58  ;;  %v680_v11 = vadd.f32 %v679_v60, %v4737_v24  ;;  %v737_v32 = vmax.f32 %v644_v55, 0.0 }
 0x154   : > { %v788_v12 = vmax.f32 %v4765_v0, %v774_v7  ;;  %v748_v14 = vmax.f32 %v678_v8, 0.0  ;;  %v4838_v0 = vadd.f32 %v4804_v4, %v4735_v23 }
 0x155   : > { %v789_v19 = vmax.f32 %v4768_v3, %v775_v10  ;;  %v749_v20 = vmax.f32 %v680_v11, 0.0  ;;  %v683_v27 = vpop.f32.mrb[50].mxu0  ;;  %v736_v3 = vmax.f32 %v642_v52, 0.0  ;;  %v4848_v5 = vld [vmem:[#allocation2] sm:$0x80] }
 0x156   : > { %802 = vst [vmem:[#allocation2 + $0x20] sm:$0xff] %v788_v12  ;;  %v776_v16 = vmax.f32 %v734_v9, %v748_v14  ;;  %v684_v29 = vadd.f32 %v683_v27, %v4735_v23  ;;  %v685_v17 = vpop.f32.mrb[51].mxu0  ;;  %v819_v21 = vld [vmem:[#allocation2 + $0x8] sm:$0x80]  ;;  %v852_v57 = vrot.slane %v4848_v5, 7  ;;  %v1107_v52 = vrot.slane %v4848_v5, 2 }
 0x157   : > { %803 = vst [vmem:[#allocation2 + $0x28] sm:$0xff] %v789_v19  ;;  %v777_v62 = vmax.f32 %v735_v61, %v749_v20  ;;  %v686_v63 = vadd.f32 %v685_v17, %v4737_v24  ;;  %v1110_v50 = vrot.slane %v819_v21, 2  ;;  %v813_v10 = vld [vmem:[#allocation2 + $0x8] sm:$0x1f] }
 0x158   : > { %v790_v2 = vmax.f32 %v4773_v13, %v776_v16  ;;  %v750_v30 = vmax.f32 %v684_v29, 0.0  ;;  %v740_v13 = vmax.f32 %v4838_v0, 0.0 }
 0x159   : > { %v791_v35 = vmax.f32 %v4776_v18, %v777_v62  ;;  %v751_v36 = vmax.f32 %v686_v63, 0.0  ;;  %v689_v4 = vpop.f32.mrb[52].mxu0  ;;  %v4854_v25 = vld [vmem:[#allocation2 + $0x10] sm:$0xf] }
 0x15a   : > { %804 = vst [vmem:[#allocation2 + $0x30] sm:$0xff] %v790_v2  ;;  %v778_v38 = vmax.f32 %v736_v3, %v750_v30  ;;  %v690_v22 = vadd.f32 %v689_v4, %v4735_v23  ;;  %v691_v39 = vpop.f32.mrb[53].mxu0  ;;  %v821_v41 = vld [vmem:[#allocation2 + $0x18] sm:$0xf]  ;;  %v4857_v56 = vld [vmem:[#allocation2 + $0x18] sm:$0xc0] }
 0x15b   : > { %805 = vst [vmem:[#allocation2 + $0x38] sm:$0xff] %v791_v35  ;;  %v779_v44 = vmax.f32 %v737_v32, %v751_v36  ;;  %v692_v45 = vadd.f32 %v691_v39, %v4737_v24  ;;  %v1111_v18 = vrot.slane %v821_v41, 2  ;;  %v856_v43 = vrot.slane %v821_v41, 7  ;;  %v4881_v3 = vld [vmem:[#allocation2 + $0x10] sm:$0xc0] }
 0x15c   : > { %v792_v48 = vmax.f32 %v4782_v31, %v778_v38  ;;  %v752_v49 = vmax.f32 %v690_v22, 0.0  ;;  %v855_v31 = vrot.slane %v819_v21, 7  ;;  %v853_v61 = vrot.slane %v4854_v25, 7 }
 0x15d   : > { %v793_v40 = vmax.f32 %v4785_v34, %v779_v44  ;;  %v753_v51 = vmax.f32 %v692_v45, 0.0  ;;  %v695_v54 = vpop.f32.mrb[54].mxu0  ;;  %v1112_v60 = vsel %vm1012_vm4, %v1110_v50, %v1111_v18  ;;  %v891_v15 = vld [vmem:[#allocation2 + $0x20] sm:$0xe0]  ;;  %v4883_v1 = vld [vmem:[#allocation2 + $0x20] sm:$0x7] }
 0x15e   : > { %806 = vst [vmem:[#allocation2 + $0x40] sm:$0xff] %v792_v48  ;;  %v780_v58 = vmax.f32 %v738_v33, %v752_v49  ;;  %v696_v59 = vadd.f32 %v695_v54, %v4735_v23  ;;  %v697_v7 = vpop.f32.mrb[55].mxu0  ;;  %v4861_v8 = vld [vmem:[#allocation2 + $0x28] sm:$0x7]  ;;  %v892_v11 = vld [vmem:[#allocation2 + $0x28] sm:$0xe0]  ;;  %v1340_v27 = vsel %vm1338_vm5, %v813_v10, %v1112_v60  ;;  %v4875_v28 = vsel %vm460_vm0, %v855_v31, %v856_v43 }
 0x15f   : > { %807 = vst [vmem:[#allocation2 + $0x48] sm:$0xff] %v793_v40  ;;  %v781_v9 = vmax.f32 %v739_v37, %v753_v51  ;;  %v698_v34 = vadd.f32 %v697_v7, %v4737_v24  ;;  %v1189_v23 = vrot.slane %v4857_v56, 4  ;;  %v1190_v55 = vrot.slane %v4861_v8, 4 }
 0x160   : > { %v794_v12 = vmax.f32 %v4792_v42, %v780_v58  ;;  %v754_v14 = vmax.f32 %v696_v59, 0.0  ;;  %v4877_v42 = vrot.slane %v892_v11, 6  ;;  %v961_v17 = vrot.slane %v892_v11, 7  ;;  %v812_v58 = vld [vmem:[#allocation2] sm:$0x1f] }
 0x161   : > { %v795_v19 = vmax.f32 %v4795_v46, %v781_v9  ;;  %v755_v20 = vmax.f32 %v698_v34, 0.0  ;;  %v4872_v24 = vld [vmem:[#allocation2 + $0x30] sm:$0x3]  ;;  %v1191_v0 = vsel %vm1185_vm6, %v1189_v23, %v1190_v55  ;;  %v4885_v2 = vrot.slane %v891_v15, 6  ;;  %v4930_v11 = vld [vmem:[#allocation2 + $0x30] sm:$0xf0] }
 0x162   : > { %808 = vst [vmem:[#allocation2 + $0x50] sm:$0xff] %v794_v12  ;;  %v782_v16 = vmax.f32 %v740_v13, %v754_v14  ;;  %v894_v29 = vld [vmem:[#allocation2 + $0x38] sm:$0x3]  ;;  %v1358_v46 = vsel %vm870_vm7, %v1111_v18, %v1191_v0  ;;  %v960_v33 = vrot.slane %v891_v15, 7  ;;  %v962_v35 = vrot.slane %v4872_v24, 7  ;;  %v4212_v14 = vld [vmem:[%s5995_s3 + $0xc8] sm:$0xff]  }
 0x163   : > { %809 = vst [vmem:[#allocation2 + $0x58] sm:$0xff] %v795_v19  ;;  %v783_v62 = vmax.f32 %v741_v47, %v755_v20  ;;  %v964_v63 = vrot.slane %v894_v29, 7  ;;  %v1376_v32 = vsel %vm951_vm8, %v1358_v46, %v4877_v42  ;;  %v1108_v37 = vrot.slane %v4854_v25, 2  ;;  %v4894_v38 = vld [vmem:[#allocation2 + $0x38] sm:$0xf0] }
 0x164   : > { %v796_v30 = vmax.f32 %v4798_v53, %v782_v16  ;;  %v1412_v21 = vpack.c.bf16 %v1376_v32, %v1340_v27  ;;  %v913_v22 = vrot.slane %v4861_v8, 7  ;;  %v1205_v39 = vrot.slane %v961_v17, 4  ;;  %v4216_v32 = vld [vmem:[%s5995_s3 + $0xd0] sm:$0xff]  }
 0x165   : > { %v797_v36 = vmax.f32 %v4800_v26, %v783_v62  ;;  %v965_v4 = vsel %vm460_vm0, %v961_v17, %v964_v63  ;;  %v909_v53 = vrot.slane %v4881_v3, 7  ;;  %v911_v41 = vrot.slane %v4883_v1, 7  ;;  %v4214_v62 = vld [vmem:[%s5995_s3 + $0x88] sm:$0xff]  }
 0x166   : > { %810 = vst [vmem:[#allocation2 + $0x60] sm:$0xff] %v796_v30  ;;  %v4899_v13 = vld [vmem:[#allocation2 + $0x48] sm:$0x1]  ;;  %v1206_v44 = vrot.slane %v965_v4, 4  ;;  %2638 = vmatprep.mubr.bf16.mxu1 %v1412_v21  ;;  %v963_v26 = vsel %vm460_vm0, %v960_v33, %v962_v35  ;;  %v1186_v45 = vrot.slane %v4881_v3, 4  ;;  %v1187_v18 = vrot.slane %v4883_v1, 4 }
 0x167   : > { %811 = vst [vmem:[#allocation2 + $0x68] sm:$0xff] %v797_v36  ;;  %v1109_v47 = vsel %vm1012_vm4, %v1107_v52, %v1108_v37  ;;  %v927_v48 = vrot.slane %v894_v29, 6  ;;  %v981_v49 = vrot.slane %v4894_v38, 6  ;;  %v984_v50 = vrot.slane %v4899_v13, 6 }
 0x168   : > { %v1137_v40 = vrot.slane %v4885_v2, 2  ;;  %v1188_v51 = vsel %vm1185_vm6, %v1186_v45, %v1187_v18  ;;  %v1020_v54 = vrot.slane %v4894_v38, 7  ;;  %v910_v43 = vrot.slane %v4857_v56, 7  ;;  %v4210_v56 = vld [vmem:[%s5995_s3 + $0x80] sm:$0xff]   ;;  %v4990_v45 = vld [vmem:[#allocation2 + $0x18] sm:$0x80] }
 0x169   : > { %v1203_v59 = vrot.slane %v963_v26, 4  ;;  %v1357_v7 = vsel %vm870_vm7, %v1108_v37, %v1188_v51  ;;  %v4914_v8 = vsel %vm870_vm7, %v4877_v42, %v927_v48  ;;  %v4919_v31 = vsel %vm870_vm7, %v981_v49, %v984_v50  ;;  %v4218_v37 = vld [vmem:[%s5995_s3 + $0x90] sm:$0xff]   ;;  %v4992_v18 = vld [vmem:[#allocation2 + $0x28] sm:$0xf]  ;;  %v4997_v51 = vld [vmem:[#allocation2 + $0x28] sm:$0xc0] }
 0x16a   : > { %v1202_v60 = vrot.slane %v960_v33, 4  ;;  %v1339_v9 = vsel %vm1338_vm5, %v812_v58, %v1109_v47  ;;  %v1375_v34 = vsel %vm951_vm8, %v1357_v7, %v4885_v2  ;;  %v1394_v10 = vsel %vm1185_vm6, %v4914_v8, %v4894_v38 }
 0x16b   : > { %v1411_v52 = vpack.c.bf16 %v1375_v34, %v1339_v9  ;;  %v1430_v12 = vpack.c.bf16 %v4899_v13, %v1394_v10  ;;  %v914_v23 = vsel %vm460_vm0, %v910_v43, %v913_v22  ;;  %v1124_v55 = vrot.slane %v910_v43, 2  ;;  %v4980_v22 = vld [vmem:[#allocation2 + $0x18] sm:$0x1f] }
 0x16c   : > { %v1125_v15 = vrot.slane %v914_v23, 2  ;;  %v1207_v19 = vsel %vm1185_vm6, %v1205_v39, %v1206_v44  ;;  %v4940_v20 = vrot.slane %v1020_v54, 6  ;;  %v854_v27 = vsel %vm460_vm0, %v852_v57, %v853_v61  ;;  %v4956_v61 = vld [vmem:[#allocation2 + $0x40] sm:$0x1]  ;;  %v4219_v39 = vld [vmem:[%s5995_s3 + $0x2c8] sm:$0xff]   ;;  %v4220_v9 = vld [vmem:[%s5995_s3 + $0xd8] sm:$0xff]  }
 0x16d   : > { %2639 = vmatmul.mubr.bf16.vlgmr.msra.gmra.mrb[0].mxu1 %v1411_v52  ;;  %v912_v16 = vsel %vm460_vm0, %v909_v53, %v911_v41  ;;  %v1019_v29 = vrot.slane %v4930_v11, 7  ;;  %v1121_v17 = vrot.slane %v909_v53, 2  ;;  %v1204_v0 = vsel %vm1185_vm6, %v1202_v60, %v1203_v59  ;;  %v4999_v43 = vld [vmem:[#allocation2 + $0x38] sm:$0x7] }
 0x16e   : > { %3822 = vmatpush3.bf16.msra.mxu1 %v4210_v56  ;;  %2646 = vmatprep.mubr.bf16.mxu1 %v1430_v12  ;;  %v1126_v25 = vsel %vm1012_vm4, %v1124_v55, %v1125_v15  ;;  %v1364_v5 = vsel %vm870_vm7, %v1125_v15, %v1207_v19  ;;  %v1122_v63 = vrot.slane %v912_v16, 2  ;;  %v925_v57 = vrot.slane %v4872_v24, 6  ;;  %v4217_v24 = vld [vmem:[%s5995_s3 + $0x280] sm:$0xff]   ;;  %v815_v12 = vld [vmem:[#allocation2 + $0x8] sm:$0x3e] }
 0x16f   : > { %3823 = vmatprep.subr.bf16.mxu1 %v4212_v14  ;;  %v1346_v46 = vsel %vm1338_vm5, %v4875_v28, %v1126_v25  ;;  %v1382_v30 = vsel %vm951_vm8, %v1364_v5, %v4940_v20  ;;  %v4967_v33 = vrot.slane %v1019_v29, 6  ;;  %v980_v35 = vrot.slane %v4930_v11, 6  ;;  %v5024_v16 = vld [vmem:[#allocation2 + $0x48] sm:$0xf8]  ;;  %v4224_v5 = vld [vmem:[%s5995_s3 + $0xe0] sm:$0xff]  }
 0x170   : > { %v1418_v36 = vpack.c.bf16 %v1382_v30, %v1346_v46  ;;  %v1123_v28 = vsel %vm1012_vm4, %v1121_v17, %v1122_v63  ;;  %v1363_v4 = vsel %vm870_vm7, %v1122_v63, %v1204_v0  ;;  %v926_v21 = vsel %vm870_vm7, %v4885_v2, %v925_v57  ;;  %v4221_v2 = vld [vmem:[%s5995_s3 + $0x288] sm:$0xff]   ;;  %v4222_v17 = vld [vmem:[%s5995_s3 + $0x98] sm:$0xff]   ;;  %v5043_v63 = vld [vmem:[#allocation2 + $0x40] sm:$0xf8] }
 0x171   : > { %v1023_v53 = vrot.slane %v4899_v13, 7  ;;  %v1345_v41 = vsel %vm1338_vm5, %v854_v27, %v1123_v28  ;;  %v1381_v44 = vsel %vm951_vm8, %v1363_v4, %v4967_v33  ;;  %v982_v26 = vrot.slane %v4956_v61, 6  ;;  %v5056_v4 = vld [vmem:[#allocation2 + $0x28] sm:$0x80] }
 0x172   : > { %3824 = vmatpush3.bf16.msra.mxu1 %v4214_v62  ;;  %2782 = vmatprep.mubr.bf16.mxu0 %v1418_v36  ;;  %v1417_v47 = vpack.c.bf16 %v1381_v44, %v1345_v41  ;;  %v1021_v48 = vrot.slane %v4956_v61, 7  ;;  %v1138_v50 = vrot.slane %v926_v21, 2  ;;  %v1393_v13 = vsel %vm1185_vm6, %v926_v21, %v4930_v11  ;;  %v5058_v21 = vld [vmem:[#allocation2 + $0x38] sm:$0xf]  ;;  %v5067_v41 = vld [vmem:[#allocation2 + $0x48] sm:$0x7] }
 0x173   : > { %3825 = vmatprep.subr.bf16.mxu1 %v4216_v32  ;;  %v983_v58 = vsel %vm870_vm7, %v980_v35, %v982_v26  ;;  %v1220_v59 = vrot.slane %v980_v35, 4  ;;  %v1429_v7 = vpack.c.bf16 %v4956_v61, %v1393_v13  ;;  %v906_v60 = vrot.slane %v4980_v22, 1  ;;  %v4225_v32 = vld [vmem:[%s5995_s3 + $0x290] sm:$0xff]  }
 0x174   : > { %2783 = vmatmul.mubr.bf16.vlgmr.msra.gmra.mrb[56].mxu0 %v1417_v47  ;;  %v5010_v34 = vsel %vm1012_vm4, %v1137_v40, %v1138_v50  ;;  %v1221_v56 = vrot.slane %v983_v58, 4  ;;  %v955_v10 = vrot.slane %v4990_v45, 1  ;;  %v956_v52 = vrot.slane %v4992_v18, 1 }
 0x175   : > { %3934 = vmatpush3.bf16.msra.mxu0 %v4217_v24  ;;  %2647 = vmatmul.mubr.bf16.gmra.mrb[4].mxu1 %v1429_v7  ;;  %v1009_v14 = vrot.slane %v4997_v51, 1  ;;  %v1010_v23 = vrot.slane %v4999_v43, 1  ;;  %v1024_v55 = vsel %vm460_vm0, %v1020_v54, %v1023_v53  ;;  %v1115_v19 = vrot.slane %v906_v60, 2  ;;  %v4223_v54 = vld [vmem:[%s5995_s3 + $0x2d0] sm:$0xff]   ;;  %v5052_v24 = vld [vmem:[#allocation2 + $0x28] sm:$0x1f] }
 0x176   : > { %v1222_v40 = vsel %vm1185_vm6, %v1220_v59, %v1221_v56  ;;  %3826 = vmatpush3.bf16.msra.mxu1 %v4218_v37  ;;  %v957_v15 = vsel %vm951_vm8, %v955_v10, %v956_v52  ;;  %v1196_v27 = vrot.slane %v956_v52, 4  ;;  %3935 = vmatprep.subr.bf16.mxu0 %v4219_v39  ;;  %v839_v57 = vrot.slane %v815_v12, 1  ;;  %v5065_v53 = vld [vmem:[#allocation2 + $0x38] sm:$0xc0] }
 0x177   : > { %v5033_v0 = vsel %vm870_vm7, %v1138_v50, %v1222_v40  ;;  %v5038_v62 = vsel %vm951_vm8, %v1009_v14, %v1010_v23  ;;  %v1195_v25 = vrot.slane %v957_v15, 4  ;;  %3827 = vmatprep.subr.bf16.mxu1 %v4220_v9  ;;  %v1282_v46 = vrot.slane %v1024_v55, 6  ;;  %v5079_v50 = vld [vmem:[#allocation2 + $0x10] sm:$0x80]  ;;  %v4227_v60 = vld [vmem:[%s5995_s3 + $0x2d8] sm:$0xff]   ;;  %v4230_v55 = vld [vmem:[%s5995_s3 + $0xa8] sm:$0xff]  }
 0x178   : > { %v1257_v61 = vrot.slane %v5038_v62, 6  ;;  %v1022_v30 = vsel %vm460_vm0, %v1019_v29, %v1021_v48  ;;  %v1078_v36 = vrot.slane %v5024_v16, 7  ;;  %v1342_v11 = vsel %vm1338_vm5, %v839_v57, %v1115_v19  ;;  %v5089_v9 = vld [vmem:[#allocation2 + $0x20] sm:$0xf]  ;;  %v4229_v14 = vld [vmem:[%s5995_s3 + $0x298] sm:$0xff]  }
 0x179   : > { %v1197_v35 = vsel %vm1185_vm6, %v1195_v25, %v1196_v27  ;;  %3936 = vmatpush3.bf16.msra.mxu0 %v4221_v2  ;;  %v1280_v28 = vrot.slane %v1022_v30, 6  ;;  %v1283_v37 = vsel %vm870_vm7, %v4940_v20, %v1282_v46  ;;  %v1077_v39 = vrot.slane %v5043_v63, 7  ;;  %v4226_v20 = vld [vmem:[%s5995_s3 + $0xa0] sm:$0xff]   ;;  %v5105_v15 = vld [vmem:[#allocation2 + $0x30] sm:$0x7] }
 0x17a   : > { %v1360_v29 = vsel %vm870_vm7, %v1115_v19, %v1197_v35  ;;  %3828 = vmatpush3.bf16.msra.mxu1 %v4222_v17  ;;  %3937 = vmatprep.subr.bf16.mxu0 %v4223_v54  ;;  %v1400_v26 = vsel %vm1185_vm6, %v1283_v37, %v1078_v36  ;;  %v918_v48 = vrot.slane %v5052_v24, 1  ;;  %v973_v7 = vrot.slane %v5056_v4, 1  ;;  %v4231_v2 = vld [vmem:[%s5995_s3 + $0x2e0] sm:$0xff]   ;;  %v5108_v27 = vld [vmem:[#allocation2 + $0x18] sm:$0x3e]  ;;  %v4232_v35 = vld [vmem:[%s5995_s3 + $0xf0] sm:$0xff]  }
 0x17b   : > { %v1378_v44 = vsel %vm951_vm8, %v1360_v29, %v1257_v61  ;;  %3829 = vmatprep.subr.bf16.mxu1 %v4224_v5  ;;  %v1281_v47 = vsel %vm870_vm7, %v4967_v33, %v1280_v28  ;;  %v1436_v58 = vpack.c.bf16 %v1078_v36, %v1400_v26  ;;  %v4228_v33 = vld [vmem:[%s5995_s3 + $0xe8] sm:$0xff]   ;;  %v974_v10 = vrot.slane %v5058_v21, 1  ;;  %v5103_v40 = vld [vmem:[#allocation2 + $0x20] sm:$0xc0]  ;;  %v5116_v5 = vld [vmem:[#allocation2 + $0x10] sm:$0x1f] }
 0x17c   : > { %v1414_v13 = vpack.c.bf16 %v1378_v44, %v1342_v11  ;;  %v1399_v59 = vsel %vm1185_vm6, %v1281_v47, %v1077_v39  ;;  %v1032_v52 = vrot.slane %v5065_v53, 1  ;;  %v1033_v12 = vrot.slane %v5067_v41, 1  ;;  %v5123_v36 = vld [vmem:[#allocation2 + $0x48] sm:$0x3]  ;;  %v4233_v28 = vld [vmem:[%s5995_s3 + $0x2a0] sm:$0xff]  }
 0x17d   : > { %v1435_v56 = vpack.c.bf16 %v1077_v39, %v1399_v59  ;;  %3938 = vmatpush3.bf16.msra.mxu0 %v4225_v32  ;;  %2790 = vmatprep.mubr.bf16.mxu0 %v1436_v58  ;;  %v952_v19 = vrot.slane %v5079_v50, 1  ;;  %v975_v17 = vsel %vm951_vm8, %v973_v7, %v974_v10  ;;  %v1218_v25 = vrot.slane %v974_v10, 4  ;;  %6015 = vst [vmem:[#allocation6_spill] sm:$0xff] %v5123_v36  ;;  %v5131_v44 = vld [vmem:[#allocation2 + $0x38] sm:$0xe0] }
 0x17e   : > { %2686 = vmatprep.mubr.bf16.mxu1 %v1414_v13  ;;  %3830 = vmatpush3.bf16.msra.mxu1 %v4226_v20  ;;  %v5114_v54 = vsel %vm951_vm8, %v1032_v52, %v1033_v12  ;;  %v953_v57 = vrot.slane %v5089_v9, 1  ;;  %v1135_v46 = vrot.slane %v918_v48, 2  ;;  %v1217_v30 = vrot.slane %v975_v17, 4  ;;  %v4234_v20 = vld [vmem:[%s5995_s3 + $0xb0] sm:$0xff]   ;;  %v4235_v48 = vld [vmem:[%s5995_s3 + $0x2e8] sm:$0xff]   ;;  %v4236_v13 = vld [vmem:[%s5995_s3 + $0xf8] sm:$0xff]  }
 0x17f   : > { %2791 = vmatmul.mubr.bf16.gmra.mrb[60].mxu0 %v1435_v56  ;;  %v6003_v32 = vrot.slane %v5114_v54, 6  ;;  %3939 = vmatprep.subr.bf16.mxu0 %v4227_v60  ;;  %v1006_v29 = vrot.slane %v5103_v40, 1  ;;  %v1007_v37 = vrot.slane %v5105_v15, 1  ;;  %v863_v26 = vrot.slane %v5108_v27, 1  ;;  %v4237_v60 = vld [vmem:[%s5995_s3 + $0x2a8] sm:$0xff]  }
 0x180   : > { %3831 = vmatprep.subr.bf16.mxu1 %v4228_v33  ;;  %v954_v11 = vsel %vm951_vm8, %v952_v19, %v953_v57  ;;  %v1193_v39 = vrot.slane %v953_v57, 4  ;;  %v1219_v47 = vsel %vm1185_vm6, %v1217_v30, %v1218_v25  ;;  %v905_v58 = vrot.slane %v5116_v5, 1  ;;  %v814_v33 = vld [vmem:[#allocation2] sm:$0x3e]  ;;  %v5164_v17 = vld [vmem:[#allocation2 + $0x20] sm:$0x80] }
 0x181   : > { %3940 = vmatpush3.bf16.msra.mxu0 %v4229_v14  ;;  %v1192_v59 = vrot.slane %v954_v11, 4  ;;  %v1368_v7 = vsel %vm870_vm7, %v1135_v46, %v1219_v47  ;;  %v5152_v56 = vsel %vm951_vm8, %v1006_v29, %v1007_v37  ;;  %v1061_v10 = vrot.slane %v5123_v36, 1  ;;  %v5155_v52 = vld [vmem:[#allocation2 + $0x20] sm:$0x1f]  ;;  %v5166_v25 = vld [vmem:[#allocation2 + $0x30] sm:$0xf] }
 0x182   : > { %3941 = vmatprep.subr.bf16.mxu0 %v4231_v2  ;;  %3832 = vmatpush3.bf16.msra.mxu1 %v4230_v55  ;;  %v1350_v14 = vsel %vm1338_vm5, %v863_v26, %v1135_v46  ;;  %v1386_v55 = vsel %vm951_vm8, %v1368_v7, %v6003_v32  ;;  %v1060_v2 = vrot.slane %v5131_v44, 1  ;;  %v1274_v19 = vrot.slane %v1010_v23, 6  ;;  %v5171_v29 = vld [vmem:[#allocation2 + $0x30] sm:$0xc0]  ;;  %v5226_v32 = vld [vmem:[#allocation2 + $0x48] sm:$0xe0] }
 0x183   : > { %3833 = vmatprep.subr.bf16.mxu1 %v4232_v35  ;;  %v1422_v30 = vpack.c.bf16 %v1386_v55, %v1350_v14  ;;  %v1194_v46 = vsel %vm1185_vm6, %v1192_v59, %v1193_v39  ;;  %v1256_v11 = vrot.slane %v5152_v56, 6  ;;  %v5173_v35 = vld [vmem:[#allocation2 + $0x40] sm:$0x7]  ;;  %v4239_v47 = vld [vmem:[%s5995_s3 + $0x2f0] sm:$0xff]   ;;  %v1113_v7 = vrot.slane %v905_v58, 2  ;;  %v4238_v39 = vld [vmem:[%s5995_s3 + $0xb8] sm:$0xff]  }
 0x184   : > { %v1275_v59 = vsel %vm870_vm7, %v1257_v61, %v1274_v19  ;;  %v970_v56 = vrot.slane %v5164_v17, 1  ;;  %v971_v58 = vrot.slane %v5166_v25, 1  ;;  %v5192_v14 = vld [vmem:[#allocation2 + $0x30] sm:$0xe0]  ;;  %v838_v55 = vrot.slane %v814_v33, 1 }
 0x185   : > { %3942 = vmatpush3.bf16.msra.mxu0 %v4233_v28  ;;  %v1062_v28 = vsel %vm951_vm8, %v1060_v2, %v1061_v10  ;;  %2878 = vmatprep.mubr.bf16.mxu0 %v1422_v30  ;;  %v4240_v2 = vld [vmem:[%s5995_s3 + $0x140] sm:$0xff]   ;;  %v1029_v62 = vrot.slane %v5171_v29, 1  ;;  %v6004_v61 = vrot.slane %v5173_v35, 1  ;;  %v5204_v30 = vrot.slane %v981_v49, 4  ;;  %v4241_v33 = vld [vmem:[%s5995_s3 + $0x2b0] sm:$0xff]   ;;  %v4243_v49 = vld [vmem:[%s5995_s3 + $0x2f8] sm:$0xff]  }
 0x186   : > { %3943 = vmatprep.subr.bf16.mxu0 %v4235_v48  ;;  %3834 = vmatpush3.bf16.msra.mxu1 %v4234_v20  ;;  %v917_v48 = vrot.slane %v5155_v52, 1  ;;  %v1359_v20 = vsel %vm870_vm7, %v1113_v7, %v1194_v46  ;;  %v5200_v19 = vld [vmem:[#allocation2 + $0x40] sm:$0x3]  ;;  %v972_v6 = vsel %vm951_vm8, %v970_v56, %v971_v58  ;;  %v1215_v57 = vrot.slane %v971_v58, 4  ;;  %v5231_v56 = vld [vmem:[#allocation2 + $0x58] sm:$0x3] }
 0x187   : > { %3835 = vmatprep.subr.bf16.mxu1 %v4236_v13  ;;  %6016 = vst [vmem:[#allocation7_spill] sm:$0xff] %v5200_v19  ;;  %v1377_v13 = vsel %vm951_vm8, %v1359_v20, %v1256_v11  ;;  %v4242_v46 = vld [vmem:[%s5995_s3 + $0x100] sm:$0xff]   ;;  %v1341_v23 = vsel %vm1338_vm5, %v838_v55, %v1113_v7  ;;  %v1396_v38 = vsel %vm1185_vm6, %v1275_v59, %v1062_v28  ;;  %v1214_v26 = vrot.slane %v972_v6, 4  ;;  %v4244_v6 = vld [vmem:[%s5995_s3 + $0x148] sm:$0xff]  }
 0x188   : > { %v5224_v20 = vsel %vm951_vm8, %v1029_v62, %v6004_v61  ;;  %v1057_v28 = vrot.slane %v5192_v14, 1  ;;  %v1058_v59 = vrot.slane %v5200_v19, 1  ;;  %v1413_v55 = vpack.c.bf16 %v1377_v13, %v1341_v23  ;;  %v4245_v61 = vld [vmem:[%s5995_s3 + $0x2b8] sm:$0xff]  }
 0x189   : > { %3944 = vmatpush3.bf16.msra.mxu0 %v4237_v60  ;;  %v5219_v60 = vld [vmem:[#allocation2 + $0x10] sm:$0x3e]  ;;  %v1264_v7 = vrot.slane %v5224_v20, 6  ;;  %v1216_v62 = vsel %vm1185_vm6, %v1214_v26, %v1215_v57  ;;  %v1088_v26 = vrot.slane %v5226_v32, 1  ;;  %v991_v20 = vrot.slane %v5131_v44, 7 }
 0x18a   : > { %3945 = vmatprep.subr.bf16.mxu0 %v4239_v47  ;;  %3836 = vmatpush3.bf16.msra.mxu1 %v4238_v39  ;;  %v1133_v47 = vrot.slane %v917_v48, 2  ;;  %v1272_v39 = vrot.slane %v1007_v37, 6  ;;  %v1432_v48 = vpack.c.bf16 %v1061_v10, %v1396_v38  ;;  %v862_v23 = vrot.slane %v5219_v60, 1  ;;  %v4246_v37 = vld [vmem:[%s5995_s3 + $0x108] sm:$0xff]   ;;  %v4247_v10 = vld [vmem:[%s5995_s3 + $0x3c0] sm:$0xff]  }
 0x18b   : > { %3849 = vmatprep.subr.bf16.mxu1 %v4240_v2  ;;  %v1059_v13 = vsel %vm951_vm8, %v1057_v28, %v1058_v59  ;;  %v1290_v38 = vrot.slane %v1033_v12, 6  ;;  %v4248_v12 = vld [vmem:[%s5995_s3 + $0x150] sm:$0xff]   ;;  %v5284_v28 = vrot.slane %v5058_v21, 2 }
 0x18c   : > { %v1367_v2 = vsel %vm870_vm7, %v1133_v47, %v1216_v62  ;;  %v1273_v57 = vsel %vm870_vm7, %v1256_v11, %v1272_v39  ;;  %v5265_v11 = vld [vmem:[#allocation2 + $0x40] sm:$0xe0]  ;;  %v5267_v39 = vld [vmem:[#allocation2 + $0x50] sm:$0x3] }
 0x18d   : > { %3946 = vmatpush3.bf16.msra.mxu0 %v4241_v33  ;;  %2687 = vmatmul.mubr.bf16.vlgmr.msra.gmra.mrb[8].mxu1 %v1413_v55  ;;  %v1089_v33 = vrot.slane %v5231_v56, 1  ;;  %v1349_v55 = vsel %vm1338_vm5, %v862_v23, %v1133_v47  ;;  %v1385_v62 = vsel %vm951_vm8, %v1367_v2, %v1264_v7  ;;  %6017 = vst [vmem:[#allocation8_spill] sm:$0xff] %v5267_v39  ;;  %v908_v23 = vrot.slane %v5108_v27, 2  ;;  %v4251_v27 = vld [vmem:[%s5995_s3 + $0x3c8] sm:$0xff]   ;;  %v4250_v21 = vld [vmem:[%s5995_s3 + $0x110] sm:$0xff]  }
 0x18e   : > { %3947 = vmatprep.subr.bf16.mxu0 %v4243_v49  ;;  %2694 = vmatprep.mubr.bf16.mxu1 %v1432_v48  ;;  %v1395_v58 = vsel %vm1185_vm6, %v1273_v57, %v1059_v13  ;;  %v817_v13 = vld [vmem:[#allocation2 + $0x8] sm:$0x7c]  ;;  %v1016_v57 = vrot.slane %v5056_v4, 2  ;;  %6019 = vst [vmem:[#allocation9_spill] sm:$0xff] %v5284_v28 }
 0x18f   : > { %3850 = vmatpush3.bf16.msra.mxu1 %v4242_v46  ;;  %v1090_v48 = vsel %vm951_vm8, %v1088_v26, %v1089_v33  ;;  %v6018_v46 = vrot.slane %v5114_v54, 6  ;;  %v3611_v26 = vrot.slane %v5052_v24, 6  ;;  %v1421_v54 = vpack.c.bf16 %v1385_v62, %v1349_v55 }
 0x190   : > { %3851 = vmatprep.subr.bf16.mxu1 %v4244_v6  ;;  %v4249_v6 = vld [vmem:[%s5995_s3 + $0x380] sm:$0xff]   ;;  %v6020_v55 = vrot.slane %v5173_v35, 1 }
 0x191   : > { %v1291_v47 = vsel %vm870_vm7, %v6018_v46, %v1290_v38  ;;  %3948 = vmatpush3.bf16.msra.mxu0 %v4245_v61  ;;  %v1119_v38 = vrot.slane %v908_v23, 2  ;;  %v1085_v61 = vrot.slane %v5265_v11, 1  ;;  %v994_v46 = vrot.slane %v5123_v36, 7 }
 0x192   : > { %v1404_v2 = vsel %vm1185_vm6, %v1291_v47, %v1090_v48  ;;  %3989 = vmatprep.subr.bf16.mxu0 %v4247_v10  ;;  %v1086_v48 = vrot.slane %v5267_v39, 1  ;;  %v5298_v10 = vsel %vm1012_vm4, %v1016_v57, %v5284_v28  ;;  %v1288_v62 = vrot.slane %v6020_v55, 6 }
 0x193   : > { %3852 = vmatpush3.bf16.msra.mxu1 %v4246_v37  ;;  %v1440_v4 = vpack.c.bf16 %v1089_v33, %v1404_v2  ;;  %v1431_v47 = vpack.c.bf16 %v1058_v59, %v1395_v58  ;;  %v845_v23 = vrot.slane %v817_v13, 2  ;;  %v6005_v49 = vrot.slane %v5298_v10, 6  ;;  %v4252_v37 = vld [vmem:[%s5995_s3 + $0x158] sm:$0xff]   ;;  %v5307_v2 = vld [vmem:[#allocation2 + $0x48] sm:$0xf0] }
 0x194   : > { %2879 = vmatmul.mubr.bf16.vlgmr.msra.gmra.mrb[64].mxu0 %v1421_v54  ;;  %3853 = vmatprep.subr.bf16.mxu1 %v4248_v12  ;;  %v1087_v33 = vsel %vm951_vm8, %v1085_v61, %v1086_v48  ;;  %v1037_v57 = vrot.slane %v5043_v63, 6  ;;  %v1362_v55 = vsel %vm870_vm7, %v1119_v38, %v3611_v26  ;;  %v4253_v59 = vld [vmem:[%s5995_s3 + $0x388] sm:$0xff]   ;;  %v1289_v58 = vsel %vm870_vm7, %v1264_v7, %v1288_v62  ;;  %v4256_v62 = vld [vmem:[%s5995_s3 + $0x160] sm:$0xff]  }
 0x195   : > { %2886 = vmatprep.mubr.bf16.mxu0 %v1440_v4  ;;  %3990 = vmatpush3.bf16.msra.mxu0 %v4249_v6  ;;  %v934_v12 = vrot.slane %v4997_v51, 7  ;;  %v1344_v13 = vsel %vm1338_vm5, %v845_v23, %v1119_v38  ;;  %v1380_v63 = vsel %vm951_vm8, %v1362_v55, %v6005_v49  ;;  %v4255_v6 = vld [vmem:[%s5995_s3 + $0x3d0] sm:$0xff]   ;;  %v937_v26 = vrot.slane %v4999_v43, 7  ;;  %v4254_v38 = vld [vmem:[%s5995_s3 + $0x118] sm:$0xff]  }
 0x196   : > { %2695 = vmatmul.mubr.bf16.gmra.mrb[12].mxu1 %v1431_v47  ;;  %3991 = vmatprep.subr.bf16.mxu0 %v4251_v27  ;;  %v992_v7 = vrot.slane %v5200_v19, 7  ;;  %v1416_v54 = vpack.c.bf16 %v1380_v63, %v1344_v13  ;;  %v1403_v61 = vsel %vm1185_vm6, %v1289_v58, %v1087_v33  ;;  %v990_v4 = vrot.slane %v5192_v14, 7  ;;  %v4257_v33 = vld [vmem:[%s5995_s3 + $0x390] sm:$0xff]  }
 0x197   : > { %3854 = vmatpush3.bf16.msra.mxu1 %v4250_v21  ;;  %v887_v47 = vrot.slane %v4992_v18, 7  ;;  %v938_v21 = vsel %vm460_vm0, %v934_v12, %v937_v26  ;;  %v995_v23 = vsel %vm460_vm0, %v991_v20, %v994_v46  ;;  %v1146_v55 = vrot.slane %v934_v12, 2  ;;  %v4259_v46 = vld [vmem:[%s5995_s3 + $0x3d8] sm:$0xff]  }
 0x198   : > { %3855 = vmatprep.subr.bf16.mxu1 %v4252_v37  ;;  %2734 = vmatprep.mubr.bf16.mxu1 %v1416_v54  ;;  %v1147_v58 = vrot.slane %v938_v21, 2  ;;  %v1229_v13 = vrot.slane %v991_v20, 4  ;;  %v1230_v37 = vrot.slane %v995_v23, 4  ;;  %v6021_v63 = vrot.slane %v5024_v16, 6 }
 0x199   : > { %3992 = vmatpush3.bf16.msra.mxu0 %v4253_v59  ;;  %v1439_v27 = vpack.c.bf16 %v1086_v48, %v1403_v61  ;;  %v886_v26 = vrot.slane %v4990_v45, 7  ;;  %v5352_v59 = vrot.slane %v5166_v25, 2  ;;  %v993_v12 = vsel %vm460_vm0, %v990_v4, %v992_v7  ;;  %v4260_v7 = vld [vmem:[%s5995_s3 + $0x168] sm:$0xff]  }
 0x19a   : > { %v5345_v49 = vrot.slane %v6021_v63, 6  ;;  %3993 = vmatprep.subr.bf16.mxu0 %v4255_v6  ;;  %v1148_v20 = vsel %vm1012_vm4, %v1146_v55, %v1147_v58  ;;  %v1231_v16 = vsel %vm1185_vm6, %v1229_v13, %v1230_v37  ;;  %v6023_v54 = vrot.slane %v5307_v2, 7  ;;  %v4258_v6 = vld [vmem:[%s5995_s3 + $0x120] sm:$0xff]  }
 0x19b   : > { %6022 = vst [vmem:[#allocation10_spill] sm:$0xff] %v5352_v59  ;;  %3856 = vmatpush3.bf16.msra.mxu1 %v4254_v38  ;;  %v888_v25 = vsel %vm460_vm0, %v886_v26, %v887_v47  ;;  %v1372_v61 = vsel %vm870_vm7, %v1147_v58, %v1231_v16  ;;  %v907_v38 = vrot.slane %v5219_v60, 2  ;;  %v1013_v21 = vrot.slane %v5164_v17, 2  ;;  %v4262_v47 = vld [vmem:[%s5995_s3 + $0x128] sm:$0xff]   ;;  %v816_v13 = vld [vmem:[#allocation2] sm:$0x7c] }
 0x19c   : > { %v5359_v48 = vrot.slane %v6023_v54, 6  ;;  %2887 = vmatmul.mubr.bf16.gmra.mrb[68].mxu0 %v1439_v27  ;;  %3857 = vmatprep.subr.bf16.mxu1 %v4256_v62  ;;  %v5371_v23 = vrot.slane %v1037_v57, 6  ;;  %v1354_v55 = vsel %vm1338_vm5, %v888_v25, %v1148_v20  ;;  %v4261_v62 = vld [vmem:[%s5995_s3 + $0x398] sm:$0xff]   ;;  %v6006_v60 = vrot.slane %v5067_v41, 2  ;;  %v4263_v57 = vld [vmem:[%s5995_s3 + $0x3e0] sm:$0xff]  }
 0x19d   : > { %3994 = vmatpush3.bf16.msra.mxu0 %v4257_v33  ;;  %v1226_v58 = vrot.slane %v990_v4, 4  ;;  %v4264_v33 = vld [vmem:[%s5995_s3 + $0x170] sm:$0xff]   ;;  %v5391_v37 = vsel %vm1012_vm4, %v1013_v21, %v5352_v59  ;;  %v1278_v63 = vrot.slane %v5284_v28, 6  ;;  %v1227_v26 = vrot.slane %v993_v12, 4  ;;  %v5397_v16 = vld [vmem:[#allocation2 + $0x40] sm:$0xf0] }
 0x19e   : > { %v1390_v27 = vsel %vm951_vm8, %v1372_v61, %v5359_v48  ;;  %3995 = vmatprep.subr.bf16.mxu0 %v4259_v46  ;;  %v1070_v20 = vrot.slane %v5065_v53, 2  ;;  %v1117_v54 = vrot.slane %v907_v38, 2  ;;  %v3610_v25 = vrot.slane %v5155_v52, 6  ;;  %v4267_v38 = vld [vmem:[%s5995_s3 + $0x3e8] sm:$0xff]  }
 0x19f   : > { %v1426_v17 = vpack.c.bf16 %v1390_v27, %v1354_v55  ;;  %3858 = vmatpush3.bf16.msra.mxu1 %v4258_v6  ;;  %v933_v61 = vrot.slane %v5103_v40, 7  ;;  %v935_v21 = vrot.slane %v5105_v15, 7  ;;  %v5402_v55 = vld [vmem:[#allocation2 + $0x58] sm:$0x1]  ;;  %v4265_v6 = vld [vmem:[%s5995_s3 + $0x3a0] sm:$0xff]   ;;  %v844_v27 = vrot.slane %v816_v13, 2 }
 0x1a0   : > { %3859 = vmatprep.subr.bf16.mxu1 %v4260_v7  ;;  %6024 = vst [vmem:[#allocation11_spill] sm:$0xff] %v5402_v55  ;;  %v1072_v7 = vsel %vm1012_vm4, %v1070_v20, %v6006_v60  ;;  %v6025_v46 = vrot.slane %v5298_v10, 6  ;;  %v4266_v20 = vld [vmem:[%s5995_s3 + $0x130] sm:$0xff]   ;;  %v1228_v60 = vsel %vm1185_vm6, %v1226_v58, %v1227_v26  ;;  %v1276_v19 = vrot.slane %v5352_v59, 6  ;;  %v4269_v58 = vld [vmem:[%s5995_s3 + $0x3a8] sm:$0xff]  }
 0x1a1   : > { %2974 = vmatprep.mubr.bf16.mxu0 %v1426_v17  ;;  %3996 = vmatpush3.bf16.msra.mxu0 %v4261_v62  ;;  %v1258_v17 = vrot.slane %v5391_v37, 6  ;;  %v936_v12 = vsel %vm460_vm0, %v933_v61, %v935_v21  ;;  %v1047_v36 = vrot.slane %v5402_v55, 7  ;;  %v884_v21 = vrot.slane %v5089_v9, 7  ;;  %v5440_v55 = vld [vmem:[#allocation2 + $0x50] sm:$0x1] }
 0x1a2   : > { %3997 = vmatprep.subr.bf16.mxu0 %v4263_v57  ;;  %v1279_v62 = vsel %vm870_vm7, %v6025_v46, %v1278_v63  ;;  %v1144_v57 = vrot.slane %v936_v12, 2  ;;  %v4268_v63 = vld [vmem:[%s5995_s3 + $0x178] sm:$0xff]   ;;  %v1343_v46 = vsel %vm1338_vm5, %v844_v27, %v1117_v54  ;;  %v1067_v13 = vrot.slane %v5171_v29, 2 }
 0x1a3   : > { %3860 = vmatpush3.bf16.msra.mxu1 %v4262_v47  ;;  %v1361_v47 = vsel %vm870_vm7, %v1117_v54, %v3610_v25  ;;  %v883_v12 = vrot.slane %v5079_v50, 7  ;;  %v1143_v4 = vrot.slane %v933_v61, 2  ;;  %v4271_v54 = vld [vmem:[%s5995_s3 + $0x3f0] sm:$0xff]   ;;  %v6026_v25 = vrot.slane %v5397_v16, 7 }
 0x1a4   : > { %3861 = vmatprep.subr.bf16.mxu1 %v4264_v33  ;;  %v1379_v26 = vsel %vm951_vm8, %v1361_v47, %v1258_v17  ;;  %v1398_v33 = vsel %vm1185_vm6, %v1279_v62, %v1072_v7  ;;  %v1371_v27 = vsel %vm870_vm7, %v1144_v57, %v1228_v60  ;;  %v6027_v47 = vrot.slane %v5173_v35, 2 }
 0x1a5   : > { %3998 = vmatpush3.bf16.msra.mxu0 %v4265_v6  ;;  %v5447_v6 = vrot.slane %v6026_v25, 6  ;;  %v6028_v62 = vrot.slane %v5307_v2, 7  ;;  %v1145_v39 = vsel %vm1012_vm4, %v1143_v4, %v1144_v57  ;;  %v1277_v25 = vsel %vm870_vm7, %v1258_v17, %v1276_v19  ;;  %v1052_v19 = vld [vmem:[#allocation2 + $0x58] sm:$0xf8] }
 0x1a6   : > { %3999 = vmatprep.subr.bf16.mxu0 %v4267_v38  ;;  %v1069_v7 = vsel %vm1012_vm4, %v1067_v13, %v6027_v47  ;;  %v4270_v38 = vld [vmem:[%s5995_s3 + $0x138] sm:$0xff]   ;;  %v1131_v59 = vrot.slane %v4992_v18, 2  ;;  %v1212_v60 = vrot.slane %v4999_v43, 4  ;;  %v1415_v28 = vpack.c.bf16 %v1379_v26, %v1343_v46  ;;  %v4272_v13 = vld [vmem:[%s5995_s3 + $0x240] sm:$0xff]   ;;  %v4273_v18 = vld [vmem:[%s5995_s3 + $0x3b0] sm:$0xff]  }
 0x1a7   : > { %v1048_v61 = vsel %vm460_vm0, %v6028_v62, %v1047_v36  ;;  %3862 = vmatpush3.bf16.msra.mxu1 %v4266_v20  ;;  %v6029_v36 = vrot.slane %v5067_v41, 2  ;;  %v885_v47 = vsel %vm460_vm0, %v883_v12, %v884_v21  ;;  %v1045_v62 = vrot.slane %v5440_v55, 7 }
 0x1a8   : > { %3863 = vmatprep.subr.bf16.mxu1 %v4268_v63  ;;  %v5475_v43 = vsel %vm951_vm8, %v1371_v27, %v5447_v6  ;;  %v1296_v4 = vrot.slane %v1048_v61, 6  ;;  %v1130_v17 = vrot.slane %v4990_v45, 2  ;;  %v1211_v57 = vrot.slane %v4997_v51, 4  ;;  %v4275_v63 = vld [vmem:[%s5995_s3 + $0x3f8] sm:$0xff]   ;;  %v4274_v45 = vld [vmem:[%s5995_s3 + $0x200] sm:$0xff]  }
 0x1a9   : > { %v1434_v20 = vpack.c.bf16 %v6029_v36, %v1398_v33  ;;  %4000 = vmatpush3.bf16.msra.mxu0 %v4269_v58  ;;  %v1353_v46 = vsel %vm1338_vm5, %v885_v47, %v1145_v39  ;;  %v1397_v21 = vsel %vm1185_vm6, %v1277_v25, %v1069_v7  ;;  %v1127_v58 = vrot.slane %v5079_v50, 2  ;;  %v4276_v50 = vld [vmem:[%s5995_s3 + $0x248] sm:$0xff]  }
 0x1aa   : > { %4001 = vmatprep.subr.bf16.mxu0 %v4271_v54  ;;  %v1128_v26 = vrot.slane %v5089_v9, 2  ;;  %v1132_v51 = vsel %vm1012_vm4, %v1130_v17, %v1131_v59  ;;  %v1213_v33 = vsel %vm1185_vm6, %v1211_v57, %v1212_v60  ;;  %v1208_v12 = vrot.slane %v5103_v40, 4  ;;  %v4277_v40 = vld [vmem:[%s5995_s3 + $0x3b8] sm:$0xff]   ;;  %v4356_v17 = vld [vmem:[#allocation2 + $0x28] sm:$0x7] }
 0x1ab   : > { %3864 = vmatpush3.bf16.msra.mxu1 %v4270_v38  ;;  %v1209_v54 = vrot.slane %v5105_v15, 4  ;;  %v1425_v9 = vpack.c.bf16 %v5475_v43, %v1353_v46  ;;  %v1104_v39 = vrot.slane %v1052_v19, 7  ;;  %v6030_v27 = vrot.slane %v5397_v16, 7  ;;  %v4355_v19 = vld [vmem:[#allocation2 + $0x18] sm:$0xc0] }
 0x1ac   : > { %3905 = vmatprep.subr.bf16.mxu1 %v4272_v13  ;;  %v1129_v61 = vsel %vm1012_vm4, %v1127_v58, %v1128_v26  ;;  %v6031_v15 = vrot.slane %v5173_v35, 2  ;;  %v1297_v25 = vsel %vm870_vm7, %v5359_v48, %v1296_v4  ;;  %v1263_v36 = vrot.slane %v5131_v44, 6  ;;  %v4278_v48 = vld [vmem:[%s5995_s3 + $0x208] sm:$0xff]  }
 0x1ad   : > { %v1046_v7 = vsel %vm460_vm0, %v6030_v27, %v1045_v62  ;;  %4002 = vmatpush3.bf16.msra.mxu0 %v4273_v18  ;;  %v1210_v60 = vsel %vm1185_vm6, %v1208_v12, %v1209_v54  ;;  %v5511_v13 = vsel %vm1338_vm5, %v5116_v5, %v1129_v61  ;;  %v1348_v47 = vsel %vm1338_vm5, %v4980_v22, %v1132_v51  ;;  %v4293_v44 = vld [vmem:[%s5995_s3 + $0x348] sm:$0xff]  }
 0x1ae   : > { %v1433_v38 = vpack.c.bf16 %v6031_v15, %v1397_v21  ;;  %2735 = vmatmul.mubr.bf16.vlgmr.msra.gmra.mrb[16].mxu1 %v1415_v28  ;;  %4003 = vmatprep.subr.bf16.mxu0 %v4275_v63  ;;  %v1366_v62 = vsel %vm870_vm7, %v1131_v59, %v1213_v33  ;;  %v1365_v18 = vsel %vm870_vm7, %v1128_v26, %v1210_v60  ;;  %v1294_v43 = vrot.slane %v1046_v7, 6  ;;  %v4279_v59 = vld [vmem:[%s5995_s3 + $0x250] sm:$0xff]  }
 0x1af   : > { %2742 = vmatprep.mubr.bf16.mxu1 %v1434_v20  ;;  %3906 = vmatpush3.bf16.msra.mxu1 %v4274_v45  ;;  %v6032_v5 = vrot.slane %v5192_v14, 6  ;;  %v874_v4 = vrot.slane %v4355_v19, 6  ;;  %v875_v22 = vrot.slane %v4356_v17, 6  ;;  %v1408_v20 = vsel %vm1185_vm6, %v1297_v25, %v1104_v39 }
 0x1b0   : > { %3907 = vmatprep.subr.bf16.mxu1 %v4276_v50  ;;  %v6033_v63 = vrot.slane %v4914_v8, 2  ;;  %v6034_v46 = vrot.slane %v4877_v42, 2  ;;  %v6035_v58 = vrot.slane %v4919_v31, 4  ;;  %v6037_v12 = vrot.slane %v4883_v1, 6  ;;  %v1051_v50 = vld [vmem:[#allocation2 + $0x50] sm:$0xf8] }
 0x1b1   : > { %v5524_v28 = vsel %vm951_vm8, %v1365_v18, %v6032_v5  ;;  %4004 = vmatpush3.bf16.msra.mxu0 %v4277_v40  ;;  %v876_v45 = vsel %vm870_vm7, %v874_v4, %v875_v22  ;;  %v6038_v54 = vrot.slane %v4881_v3, 6  ;;  %v5553_v31 = vsel %vm951_vm8, %v5033_v0, %v5371_v23  ;;  %v4280_v0 = vld [vmem:[%s5995_s3 + $0x210] sm:$0xff]  }
 0x1b2   : > { %v1419_v57 = vpack.c.bf16 %v5524_v28, %v5511_v13  ;;  %v1142_v21 = vsel %vm1012_vm4, %v6034_v46, %v6033_v63  ;;  %v1225_v26 = vsel %vm1185_vm6, %v5204_v30, %v6035_v58  ;;  %v6036_v51 = vmov %v6033_v63  ;;  %v4285_v63 = vld [vmem:[%s5995_s3 + $0x268] sm:$0xff]   ;;  %v6044_v58 = vld [vmem:[#allocation6_spill] sm:$0xff] }
 0x1b3   : > { %v1370_v33 = vsel %vm870_vm7, %v6036_v51, %v1225_v26  ;;  %v873_v42 = vsel %vm870_vm7, %v6038_v54, %v6037_v12  ;;  %v1384_v30 = vsel %vm951_vm8, %v1366_v62, %v1263_v36  ;;  %v5559_v8 = vsel %vm1338_vm5, %v876_v45, %v1142_v21  ;;  %3908 = vmatpush3.bf16.msra.mxu1 %v4278_v48  ;;  %v4286_v46 = vld [vmem:[%s5995_s3 + $0x228] sm:$0xff]   ;;  %v4287_v21 = vld [vmem:[%s5995_s3 + $0x270] sm:$0xff]   ;;  %v4289_v51 = vld [vmem:[%s5995_s3 + $0x278] sm:$0xff]  }
 0x1b4   : > { %v5563_v1 = vsel %vm951_vm8, %v1370_v33, %v5345_v49  ;;  %v5567_v3 = vsel %vm1338_vm5, %v873_v42, %v5010_v34  ;;  %v1444_v27 = vpack.c.bf16 %v1104_v39, %v1408_v20  ;;  %v1295_v7 = vsel %vm870_vm7, %v5447_v6, %v1294_v43  ;;  %2975 = vmatmul.mubr.bf16.vlgmr.msra.gmra.mrb[72].mxu0 %v1425_v9  ;;  %v4281_v34 = vld [vmem:[%s5995_s3 + $0x258] sm:$0xff]   ;;  %v6042_v43 = vld [vmem:[#allocation8_spill] sm:$0xff]  ;;  %v4288_v45 = vld [vmem:[%s5995_s3 + $0x230] sm:$0xff]  }
 0x1b5   : > { %v1424_v61 = vpack.c.bf16 %v5563_v1, %v5559_v8  ;;  %v1423_v40 = vpack.c.bf16 %v5553_v31, %v5567_v3  ;;  %3909 = vmatprep.subr.bf16.mxu1 %v4279_v59  ;;  %v1235_v39 = vrot.slane %v5065_v53, 4  ;;  %v1236_v15 = vrot.slane %v5067_v41, 4  ;;  %v4284_v20 = vld [vmem:[%s5995_s3 + $0x220] sm:$0xff]   ;;  %v4290_v33 = vld [vmem:[%s5995_s3 + $0x238] sm:$0xff]   ;;  %v4301_v8 = vld [vmem:[%s5995_s3 + $0x368] sm:$0xff]  }
 0x1b6   : > { %v1271_v25 = vrot.slane %v5226_v32, 6  ;;  %v5587_v6 = vsel %vm1338_vm5, %v5052_v24, %v5298_v10  ;;  %2982 = vmatprep.mubr.bf16.mxu0 %v1444_v27  ;;  %v1420_v60 = vpack.c.bf16 %v1384_v30, %v1348_v47  ;;  %v1103_v62 = vrot.slane %v1051_v50, 7  ;;  %2743 = vmatmul.mubr.bf16.gmra.mrb[20].mxu1 %v1433_v38  ;;  %v4291_v54 = vld [vmem:[%s5995_s3 + $0x340] sm:$0xff]   ;;  %v4297_v28 = vld [vmem:[%s5995_s3 + $0x358] sm:$0xff]   ;;  %v4302_v1 = vld [vmem:[%s5995_s3 + $0x328] sm:$0xff]  }
 0x1b7   : > { %v1232_v9 = vrot.slane %v5171_v29, 4  ;;  %v1233_v18 = vrot.slane %v5173_v35, 4  ;;  %v1270_v48 = vrot.slane %v5265_v11, 6  ;;  %v1237_v53 = vsel %vm1185_vm6, %v1235_v39, %v1236_v15  ;;  %3910 = vmatpush3.bf16.msra.mxu1 %v4280_v0  ;;  %v4282_v29 = vld [vmem:[%s5995_s3 + $0x218] sm:$0xff]   ;;  %v6040_v11 = vld [vmem:[#allocation9_spill] sm:$0xff]  ;;  %v4292_v27 = vld [vmem:[%s5995_s3 + $0x300] sm:$0xff]  }
 0x1b8   : > { %v5596_v41 = vsel %vm1338_vm5, %v5155_v52, %v5391_v37  ;;  %v6039_v24 = vrot.slane %v5231_v56, 6  ;;  %2830 = vmatprep.mubr.bf16.mxu1 %v1420_v60  ;;  %v1407_v35 = vsel %vm1185_vm6, %v1295_v7, %v1103_v62  ;;  %v1374_v10 = vsel %vm870_vm7, %v6040_v11, %v1237_v53  ;;  %3911 = vmatprep.subr.bf16.mxu1 %v4281_v34  ;;  %v4283_v52 = vld [vmem:[%s5995_s3 + $0x260] sm:$0xff]   ;;  %v6041_v37 = vld [vmem:[#allocation10_spill] sm:$0xff]  ;;  %v4294_v34 = vld [vmem:[%s5995_s3 + $0x308] sm:$0xff]  }
 0x1b9   : > { %v1234_v38 = vsel %vm1185_vm6, %v1232_v9, %v1233_v18  ;;  %v5614_v56 = vsel %vm951_vm8, %v1374_v10, %v1271_v25  ;;  %v6043_v5 = vrot.slane %v6042_v43, 6  ;;  %v1443_v22 = vpack.c.bf16 %v1103_v62, %v1407_v35  ;;  %v6045_v42 = vld [vmem:[#allocation7_spill] sm:$0xff]  ;;  %v4295_v39 = vld [vmem:[%s5995_s3 + $0x350] sm:$0xff]   ;;  %v4309_v35 = vld [vmem:[%s5995_s3 + $0x448] sm:$0xff]  }
 0x1ba   : > { %v5601_v32 = vsel %vm870_vm7, %v1271_v25, %v6039_v24  ;;  %v1373_v47 = vsel %vm870_vm7, %v6041_v37, %v1234_v38  ;;  %v1428_v4 = vpack.c.bf16 %v5614_v56, %v5587_v6  ;;  %v1286_v26 = vrot.slane %v6044_v58, 6  ;;  %v4304_v25 = vld [vmem:[%s5995_s3 + $0x330] sm:$0xff]   ;;  %v1050_v60 = vld [vmem:[#allocation2 + $0x58] sm:$0x7c]  ;;  %v4315_v37 = vld [vmem:[%s5995_s3 + $0x460] sm:$0xff]  }
 0x1bb   : > { %v5621_v19 = vsel %vm870_vm7, %v1270_v48, %v6043_v5  ;;  %v5626_v17 = vsel %vm951_vm8, %v1373_v47, %v1270_v48  ;;  %3912 = vmatpush3.bf16.msra.mxu1 %v4282_v29  ;;  %v1284_v30 = vrot.slane %v6045_v42, 6  ;;  %v6047_v7 = vrot.slane %v5192_v14, 6  ;;  %v4296_v14 = vld [vmem:[%s5995_s3 + $0x310] sm:$0xff]   ;;  %v4305_v62 = vld [vmem:[%s5995_s3 + $0x378] sm:$0xff]   ;;  %v4307_v48 = vld [vmem:[%s5995_s3 + $0x440] sm:$0xff]  }
 0x1bc   : > { %v1427_v59 = vpack.c.bf16 %v5626_v17, %v5596_v41  ;;  %2983 = vmatmul.mubr.bf16.gmra.mrb[76].mxu0 %v1443_v22  ;;  %3913 = vmatprep.subr.bf16.mxu1 %v4283_v52  ;;  %v1287_v12 = vsel %vm870_vm7, %v1263_v36, %v1286_v26  ;;  %v6046_v36 = vld [vmem:[#allocation11_spill] sm:$0xff]  ;;  %v1098_v9 = vrot.slane %v1050_v60, 6  ;;  %v1049_v24 = vld [vmem:[#allocation2 + $0x50] sm:$0x7c]  ;;  %v4317_v6 = vld [vmem:[%s5995_s3 + $0x468] sm:$0xff]  }
 0x1bd   : > { %v1402_v50 = vsel %vm1185_vm6, %v1287_v12, %v5307_v2  ;;  %v1285_v2 = vsel %vm870_vm7, %v6047_v7, %v1284_v30  ;;  %v4306_v18 = vld [vmem:[%s5995_s3 + $0x338] sm:$0xff]   ;;  %v4308_v29 = vld [vmem:[%s5995_s3 + $0x400] sm:$0xff]   ;;  %v1097_v10 = vrot.slane %v1049_v24, 6  ;;  %v4311_v38 = vld [vmem:[%s5995_s3 + $0x450] sm:$0xff]  }
 0x1be   : > { %v1438_v0 = vpack.c.bf16 %v6046_v36, %v1402_v50  ;;  %v1401_v15 = vsel %vm1185_vm6, %v1285_v2, %v5397_v16  ;;  %v4298_v16 = vld [vmem:[%s5995_s3 + $0x318] sm:$0xff]   ;;  %v1406_v53 = vsel %vm1185_vm6, %v5345_v49, %v1098_v9  ;;  %v4310_v49 = vld [vmem:[%s5995_s3 + $0x408] sm:$0xff]   ;;  %v4312_v31 = vld [vmem:[%s5995_s3 + $0x410] sm:$0xff]  }
 0x1bf   : > { %3914 = vmatpush3.bf16.msra.mxu1 %v4284_v20  ;;  %v1437_v13 = vpack.c.bf16 %v5440_v55, %v1401_v15  ;;  %v4299_v55 = vld [vmem:[%s5995_s3 + $0x360] sm:$0xff]   ;;  %v1442_v11 = vpack.c.bf16 %v1098_v9, %v1406_v53  ;;  %v1405_v52 = vsel %vm1185_vm6, %v5371_v23, %v1097_v10  ;;  %v4314_v23 = vld [vmem:[%s5995_s3 + $0x418] sm:$0xff]   ;;  %v4318_v56 = vld [vmem:[%s5995_s3 + $0x428] sm:$0xff]  }
 0x1c0   : > { %3915 = vmatprep.subr.bf16.mxu1 %v4285_v63  ;;  %v1441_v3 = vpack.c.bf16 %v1097_v10, %v1405_v52  ;;  %v4316_v47 = vld [vmem:[%s5995_s3 + $0x420] sm:$0xff]   ;;  %v4319_v43 = vld [vmem:[%s5995_s3 + $0x470] sm:$0xff]   ;;  %v4322_v22 = vld [vmem:[%s5995_s3 + $0x438] sm:$0xff]  }
 0x1c1   : > { %v4320_v5 = vld [vmem:[%s5995_s3 + $0x430] sm:$0xff]   ;;  %v1054_v20 = vld [vmem:[#allocation2 + $0x58] sm:$0xf0]  ;;  %v1056_v63 = vld [vmem:[#allocation2 + $0x68] sm:$0x1] }
 0x1c2   : > { %v1053_v58 = vld [vmem:[#allocation2 + $0x50] sm:$0xf0]  ;;  %v1055_v26 = vld [vmem:[#allocation2 + $0x60] sm:$0x1]  ;;  %v4325_v15 = vld [vmem:[%s5997_s5 + $0x48] sm:$0xff]  }
 0x1c3   : > { %3916 = vmatpush3.bf16.msra.mxu1 %v4286_v46  ;;  %v1410_v46 = vsel %vm1185_vm6, %v5601_v32, %v1054_v20  ;;  %v4332_v20 = vld [vmem:[%s5997_s5 + $0x88] sm:$0xff]  }
 0x1c4   : > { %3917 = vmatprep.subr.bf16.mxu1 %v4287_v21  ;;  %v1446_v21 = vpack.c.bf16 %v1056_v63, %v1410_v46  ;;  %v4333_v63 = vld [vmem:[%s5997_s5 + $0x58] sm:$0xff]  }
 0x1c7   : > { %3918 = vmatpush3.bf16.msra.mxu1 %v4288_v45  ;;  %v1409_v45 = vsel %vm1185_vm6, %v5621_v19, %v1053_v58  ;;  %v4335_v58 = vld [vmem:[%s5997_s5 + $0xd0] sm:$0xff]  }
 0x1c8   : > { %3919 = vmatprep.subr.bf16.mxu1 %v4289_v51  ;;  %v1445_v51 = vpack.c.bf16 %v1055_v26, %v1409_v45 }
 0x1cb   : > { %3920 = vmatpush3.bf16.msra.mxu1 %v4290_v33 }
 0x1cc   : > { %3961 = vmatprep.subr.bf16.mxu1 %v4291_v54 }
 0x1ce   : > { %2831 = vmatmul.mubr.bf16.vlgmr.msra.gmra.mrb[24].mxu1 %v1419_v57  ;;  %v4300_v57 = vld [vmem:[%s5995_s3 + $0x320] sm:$0xff]  }
 0x1cf   : > { %2838 = vmatprep.mubr.bf16.mxu1 %v1438_v0  ;;  %3962 = vmatpush3.bf16.msra.mxu1 %v4292_v27 }
 0x1d0   : > { %3963 = vmatprep.subr.bf16.mxu1 %v4293_v44 }
 0x1d3   : > { %3964 = vmatpush3.bf16.msra.mxu1 %v4294_v34  ;;  %v4323_v34 = vld [vmem:[%s5997_s5 + $0x40] sm:$0xff]  }
 0x1d4   : > { %3965 = vmatprep.subr.bf16.mxu1 %v4295_v39  ;;  %v4324_v39 = vld [vmem:[%s5997_s5] sm:$0xff]   ;;  %4045 = vmatprep.subr.bf16.mxu0 %v4323_v34  ;;  %v4351_v34 = vld [vmem:[%s5997_s5 + $0xf0] sm:$0xff]  }
 0x1d5   : > { %4046 = vmatpush3.bf16.msra.mxu0 %v4324_v39 }
 0x1d6   : > { %2839 = vmatmul.mubr.bf16.gmra.mrb[28].mxu1 %v1437_v13  ;;  %v4328_v13 = vld [vmem:[%s5997_s5 + $0x80] sm:$0xff]   ;;  %4047 = vmatprep.subr.bf16.mxu0 %v4325_v15 }
 0x1d7   : > { %3966 = vmatpush3.bf16.msra.mxu1 %v4296_v14  ;;  %2926 = vmatprep.mubr.bf16.mxu1 %v1424_v61  ;;  %v4303_v61 = vld [vmem:[%s5995_s3 + $0x370] sm:$0xff]   ;;  %v4327_v14 = vld [vmem:[%s5997_s5 + $0xc0] sm:$0xff]  }
 0x1d8   : > { %3967 = vmatprep.subr.bf16.mxu1 %v4297_v28  ;;  %v4326_v28 = vld [vmem:[%s5997_s5 + $0x8] sm:$0xff]  }
 0x1d9   : > { %4048 = vmatpush3.bf16.msra.mxu0 %v4326_v28 }
 0x1db   : > { %3968 = vmatpush3.bf16.msra.mxu1 %v4298_v16  ;;  %v4329_v16 = vld [vmem:[%s5997_s5 + $0x50] sm:$0xff]  }
 0x1dc   : > { %3969 = vmatprep.subr.bf16.mxu1 %v4299_v55  ;;  %4049 = vmatprep.subr.bf16.mxu0 %v4329_v16  ;;  %v4353_v16 = vld [vmem:[%s5997_s5 + $0xf8] sm:$0xff]  }
 0x1df   : > { %3970 = vmatpush3.bf16.msra.mxu1 %v4300_v57 }
 0x1e0   : > { %3971 = vmatprep.subr.bf16.mxu1 %v4301_v8 }
 0x1e3   : > { %3972 = vmatpush3.bf16.msra.mxu1 %v4302_v1 }
 0x1e4   : > { %3973 = vmatprep.subr.bf16.mxu1 %v4303_v61 }
 0x1e7   : > { %3974 = vmatpush3.bf16.msra.mxu1 %v4304_v25  ;;  %v3612_v25 = vld [vmem:[%s5996_s4] ss:$0 sm:$0xff] }
 0x1e8   : > { %3975 = vmatprep.subr.bf16.mxu1 %v4305_v62  ;;  %v4330_v62 = vld [vmem:[%s5997_s5 + $0x10] sm:$0xff]  }
 0x1e9   : > { %4050 = vmatpush3.bf16.msra.mxu0 %v4330_v62 }
 0x1ea   : > { %4051 = vmatprep.subr.bf16.mxu0 %v4333_v63 }
 0x1eb   : > { %3976 = vmatpush3.bf16.msra.mxu1 %v4306_v18 }
 0x1ec   : > { %4017 = vmatprep.subr.bf16.mxu1 %v4307_v48 }
 0x1ee   : > { %2927 = vmatmul.mubr.bf16.vlgmr.msra.gmra.mrb[32].mxu1 %v1423_v40  ;;  %v4313_v40 = vld [vmem:[%s5995_s3 + $0x458] sm:$0xff]  }
 0x1ef   : > { %2934 = vmatprep.mubr.bf16.mxu1 %v1442_v11  ;;  %4018 = vmatpush3.bf16.msra.mxu1 %v4308_v29 }
 0x1f0   : > { %4019 = vmatprep.subr.bf16.mxu1 %v4309_v35 }
 0x1f3   : > { %4020 = vmatpush3.bf16.msra.mxu1 %v4310_v49 }
 0x1f4   : > { %4021 = vmatprep.subr.bf16.mxu1 %v4311_v38 }
 0x1f6   : > { %2935 = vmatmul.mubr.bf16.gmra.mrb[36].mxu1 %v1441_v3 }
 0x1f7   : > { %4022 = vmatpush3.bf16.msra.mxu1 %v4312_v31  ;;  %3022 = vmatprep.mubr.bf16.mxu1 %v1428_v4  ;;  %v4321_v4 = vld [vmem:[%s5995_s3 + $0x478] sm:$0xff]  }
 0x1f8   : > { %4023 = vmatprep.subr.bf16.mxu1 %v4313_v40 }
 0x1fb   : > { %4024 = vmatpush3.bf16.msra.mxu1 %v4314_v23 }
 0x1fc   : > { %4025 = vmatprep.subr.bf16.mxu1 %v4315_v37 }
 0x1ff   : > { %4026 = vmatpush3.bf16.msra.mxu1 %v4316_v47 }
 0x200   : > { %4027 = vmatprep.subr.bf16.mxu1 %v4317_v6 }
 0x203   : > { %4028 = vmatpush3.bf16.msra.mxu1 %v4318_v56 }
 0x204   : > { %4029 = vmatprep.subr.bf16.mxu1 %v4319_v43 }
 0x207   : > { %4030 = vmatpush3.bf16.msra.mxu1 %v4320_v5 }
 0x208   : > { %4031 = vmatprep.subr.bf16.mxu1 %v4321_v4 }
 0x20b   : > { %4032 = vmatpush3.bf16.msra.mxu1 %v4322_v22  ;;  %v4331_v22 = vld [vmem:[%s5997_s5 + $0xc8] sm:$0xff]  }
 0x20c   : > { %4067 = vmatprep.subr.bf16.mxu1 %v4327_v14  ;;  %v4352_v14 = vld [vmem:[%s5997_s5 + $0xb0] sm:$0xff]  }
 0x20e   : > { %3023 = vmatmul.mubr.bf16.vlgmr.msra.gmra.mrb[40].mxu1 %v1427_v59 }
 0x20f   : > { %3030 = vmatprep.mubr.bf16.mxu1 %v1446_v21  ;;  %4068 = vmatpush3.bf16.msra.mxu1 %v4328_v13  ;;  %v4334_v21 = vld [vmem:[%s5997_s5 + $0x18] sm:$0xff]  }
 0x210   : > { %4069 = vmatprep.subr.bf16.mxu1 %v4331_v22  ;;  %4052 = vmatpush3.bf16.msra.mxu0 %v4334_v21 }
 0x213   : > { %4070 = vmatpush3.bf16.msra.mxu1 %v4332_v20 }
 0x214   : > { %4071 = vmatprep.subr.bf16.mxu1 %v4335_v58 }
 0x216   : > { %3031 = vmatmul.mubr.bf16.gmra.mrb[44].mxu1 %v1445_v51  ;;  %v4337_v51 = vld [vmem:[%s5997_s5 + $0x60] sm:$0xff]  }
 0x217   : > { %4053 = vmatprep.subr.bf16.mxu0 %v4337_v51 }
 0x240   : > { %v3809_v33 = vpop.f32.mrb[0].mxu1 }
 0x241   : > { %v3810_v12 = vpop.f32.mrb[1].mxu1 }
 0x242   : > { %v3811_v54 = vadd.f32 %v3810_v12, %v3809_v33  ;;  %v3812_v42 = vpop.f32.mrb[2].mxu1  ;;  %v4336_v12 = vld [vmem:[%s5997_s5 + $0x90] sm:$0xff]  }
 0x243   : > { %v3813_v30 = vpop.f32.mrb[3].mxu1  ;;  %4072 = vmatpush3.bf16.msra.mxu1 %v4336_v12 }
 0x244   : > { %v3814_v32 = vadd.f32 %v3813_v30, %v3812_v42  ;;  %v2641_v18 = vadd.f32 %v3811_v54, %v3612_v25  ;;  %v4338_v54 = vld [vmem:[%s5997_s5 + $0x20] sm:$0xff]   ;;  %v4339_v42 = vld [vmem:[%s5997_s5 + $0xd8] sm:$0xff]   ;;  %v4341_v30 = vld [vmem:[%s5997_s5 + $0x68] sm:$0xff]  }
 0x245   : > { %4054 = vmatpush3.bf16.msra.mxu0 %v4338_v54  ;;  %4073 = vmatprep.subr.bf16.mxu1 %v4339_v42 }
 0x246   : > { %v2644_v29 = vadd.f32 %v3814_v32, %v3612_v25  ;;  %v4340_v32 = vld [vmem:[%s5997_s5 + $0x98] sm:$0xff]   ;;  %4055 = vmatprep.subr.bf16.mxu0 %v4341_v30 }
 0x247   : > { %v3893_v50 = vpop.f32.mrb[56].mxu0  ;;  %4074 = vmatpush3.bf16.msra.mxu1 %v4340_v32 }
 0x248   : > { %v3815_v27 = vpop.f32.mrb[4].mxu1  ;;  %v3894_v44 = vpop.f32.mrb[57].mxu0 }
 0x249   : > { %v5784_v36 = vadd.f32 %v3894_v44, %v3893_v50  ;;  %v3816_v41 = vpop.f32.mrb[5].mxu1  ;;  %v3896_v17 = vpop.f32.mrb[58].mxu0  ;;  %v4342_v50 = vld [vmem:[%s5997_s5 + $0x28] sm:$0xff]   ;;  %v4345_v44 = vld [vmem:[%s5997_s5 + $0x70] sm:$0xff]  }
 0x24a   : > { %v3817_v59 = vadd.f32 %v3816_v41, %v3815_v27  ;;  %v3818_v0 = vpop.f32.mrb[6].mxu1  ;;  %v3897_v7 = vpop.f32.mrb[59].mxu0  ;;  %v4343_v27 = vld [vmem:[%s5997_s5 + $0xe0] sm:$0xff]   ;;  %4056 = vmatpush3.bf16.msra.mxu0 %v4342_v50 }
 0x24b   : > { %v5786_v2 = vadd.f32 %v3897_v7, %v3896_v17  ;;  %v3819_v19 = vpop.f32.mrb[7].mxu1  ;;  %v4344_v41 = vld [vmem:[%s5997_s5 + $0xa0] sm:$0xff]   ;;  %v4346_v17 = vld [vmem:[%s5997_s5 + $0x30] sm:$0xff]   ;;  %4075 = vmatprep.subr.bf16.mxu1 %v4343_v27  ;;  %4057 = vmatprep.subr.bf16.mxu0 %v4345_v44  ;;  %v4349_v0 = vld [vmem:[%s5997_s5 + $0x78] sm:$0xff]  }
 0x24c   : > { %v2649_v37 = vadd.f32 %v3817_v59, %v3612_v25  ;;  %v4347_v59 = vld [vmem:[%s5997_s5 + $0xe8] sm:$0xff]   ;;  %4076 = vmatpush3.bf16.msra.mxu1 %v4344_v41  ;;  %v4350_v19 = vld [vmem:[%s5997_s5 + $0x38] sm:$0xff]  }
 0x24d   : > { %v4348_v7 = vld [vmem:[%s5997_s5 + $0xa8] sm:$0xff]   ;;  %4077 = vmatprep.subr.bf16.mxu1 %v4347_v59  ;;  %v4354_v25 = vld [vmem:[%s5997_s5 + $0xb8] sm:$0xff]  }
 0x24e   : > { %4058 = vmatpush3.bf16.msra.mxu0 %v4346_v17 }
 0x24f   : > { %4059 = vmatprep.subr.bf16.mxu0 %v4349_v0 }
 0x250   : > { %4078 = vmatpush3.bf16.msra.mxu1 %v4348_v7 }
 0x251   : > { %4079 = vmatprep.subr.bf16.mxu1 %v4351_v34 }
 0x252   : > { %v3899_v55 = vpop.f32.mrb[60].mxu0  ;;  %4060 = vmatpush3.bf16.msra.mxu0 %v4350_v19 }
 0x253   : > { %v3900_v57 = vpop.f32.mrb[61].mxu0 }
 0x254   : > { %v5809_v8 = vadd.f32 %v3900_v57, %v3899_v55  ;;  %v3902_v1 = vpop.f32.mrb[62].mxu0  ;;  %v4423_v55 = vmov 0.0|0.0   ;;  %4080 = vmatpush3.bf16.msra.mxu1 %v4352_v14 }
 0x255   : > { %v3903_v61 = vpop.f32.mrb[63].mxu0  ;;  %4123 = vmatprep.subr.bf16.mxu0 %v4423_v55  ;;  %4081 = vmatprep.subr.bf16.mxu1 %v4353_v16 }
 0x258   : > { %4082 = vmatpush3.bf16.msra.mxu1 %v4354_v25 }
 0x260   : > { %v3837_v60 = vpop.f32.mrb[8].mxu1 }
 0x261   : > { %v3838_v9 = vpop.f32.mrb[9].mxu1 }
 0x262   : > { %v3839_v48 = vadd.f32 %v3838_v9, %v3837_v60  ;;  %v3840_v53 = vpop.f32.mrb[10].mxu1 }
 0x263   : > { %v3841_v24 = vpop.f32.mrb[11].mxu1 }
 0x264   : > { %v5817_v35 = vadd.f32 %v3839_v48, %v2641_v18  ;;  %v3842_v11 = vadd.f32 %v3841_v24, %v3840_v53 }
 0x266   : > { %v5819_v10 = vadd.f32 %v3842_v11, %v2644_v29 }
 0x267   : > { %v3949_v49 = vpop.f32.mrb[64].mxu0 }
 0x268   : > { %v3950_v38 = vpop.f32.mrb[65].mxu0 }
 0x269   : > { %v3843_v52 = vpop.f32.mrb[12].mxu1  ;;  %v5821_v31 = vadd.f32 %v3950_v38, %v3949_v49  ;;  %v3952_v3 = vpop.f32.mrb[66].mxu0 }
 0x26a   : > { %v3844_v40 = vpop.f32.mrb[13].mxu1  ;;  %v3953_v23 = vpop.f32.mrb[67].mxu0 }
 0x26b   : > { %v3845_v47 = vadd.f32 %v3844_v40, %v3843_v52  ;;  %v3846_v6 = vpop.f32.mrb[14].mxu1  ;;  %v5823_v56 = vadd.f32 %v3953_v23, %v3952_v3 }
 0x26c   : > { %v3847_v43 = vpop.f32.mrb[15].mxu1 }
 0x26d   : > { %v5825_v5 = vadd.f32 %v3845_v47, %v2649_v37 }
 0x26f   : > { %v3955_v4 = vpop.f32.mrb[68].mxu0 }
 0x270   : > { %v3956_v46 = vpop.f32.mrb[69].mxu0 }
 0x271   : > { %v5842_v26 = vadd.f32 %v3956_v46, %v3955_v4  ;;  %v3958_v45 = vpop.f32.mrb[70].mxu0 }
 0x272   : > { %v3959_v33 = vpop.f32.mrb[71].mxu0 }
 0x281   : > { %v3865_v39 = vpop.f32.mrb[16].mxu1 }
 0x282   : > { %v3866_v15 = vpop.f32.mrb[17].mxu1 }
 0x283   : > { %v3867_v13 = vadd.f32 %v3866_v15, %v3865_v39  ;;  %v3868_v28 = vpop.f32.mrb[18].mxu1 }
 0x284   : > { %v3869_v57 = vpop.f32.mrb[19].mxu1 }
 0x285   : > { %v2737_v1 = vadd.f32 %v3867_v13, %v5817_v35  ;;  %v3870_v61 = vadd.f32 %v3869_v57, %v3868_v28 }
 0x287   : > { %v2740_v60 = vadd.f32 %v3870_v61, %v5819_v10  ;;  %v4005_v62 = vpop.f32.mrb[72].mxu0  ;;  %v2785_v9 = vadd.f32 %v5784_v36, %v2737_v1 }
 0x288   : > { %v4006_v18 = vpop.f32.mrb[73].mxu0 }
 0x289   : > { %v3871_v48 = vpop.f32.mrb[20].mxu1  ;;  %v4007_v53 = vadd.f32 %v4006_v18, %v4005_v62  ;;  %v4008_v24 = vpop.f32.mrb[74].mxu0  ;;  %v2788_v29 = vadd.f32 %v5786_v2, %v2740_v60 }
 0x28a   : > { %v3872_v11 = vpop.f32.mrb[21].mxu1  ;;  %v4009_v35 = vpop.f32.mrb[75].mxu0 }
 0x28b   : > { %v3873_v49 = vadd.f32 %v3872_v11, %v3871_v48  ;;  %v3874_v38 = vpop.f32.mrb[22].mxu1  ;;  %v4010_v52 = vadd.f32 %v4009_v35, %v4008_v24 }
 0x28c   : > { %v3875_v3 = vpop.f32.mrb[23].mxu1 }
 0x28d   : > { %v2745_v40 = vadd.f32 %v3873_v49, %v5825_v5 }
 0x28f   : > { %v4011_v10 = vpop.f32.mrb[76].mxu0  ;;  %v2793_v23 = vadd.f32 %v5809_v8, %v2745_v40 }
 0x290   : > { %v4012_v36 = vpop.f32.mrb[77].mxu0 }
 0x291   : > { %v4013_v37 = vadd.f32 %v4012_v36, %v4011_v10  ;;  %v4014_v47 = vpop.f32.mrb[78].mxu0  ;;  %v3422_v36 = vld [vmem:[%s5999_s7] sm:$0xff] }
 0x292   : > { %v4015_v6 = vpop.f32.mrb[79].mxu0 }
 0x2a1   : > { %v3921_v43 = vpop.f32.mrb[24].mxu1 }
 0x2a2   : > { %v3922_v4 = vpop.f32.mrb[25].mxu1 }
 0x2a3   : > { %v3923_v22 = vadd.f32 %v3922_v4, %v3921_v43  ;;  %v3924_v2 = vpop.f32.mrb[26].mxu1 }
 0x2a4   : > { %v3925_v20 = vpop.f32.mrb[27].mxu1 }
 0x2a5   : > { %v2833_v63 = vadd.f32 %v3923_v22, %v2785_v9  ;;  %v3926_v46 = vadd.f32 %v3925_v20, %v3924_v2 }
 0x2a7   : > { %v2836_v21 = vadd.f32 %v3926_v46, %v2788_v29  ;;  %v2881_v58 = vadd.f32 %v5821_v31, %v2833_v63 }
 0x2a9   : > { %v3927_v45 = vpop.f32.mrb[28].mxu1  ;;  %v2884_v5 = vadd.f32 %v5823_v56, %v2836_v21 }
 0x2aa   : > { %v3928_v51 = vpop.f32.mrb[29].mxu1 }
 0x2ab   : > { %v3929_v33 = vadd.f32 %v3928_v51, %v3927_v45  ;;  %v3930_v8 = vpop.f32.mrb[30].mxu1 }
 0x2ac   : > { %v3931_v12 = vpop.f32.mrb[31].mxu1 }
 0x2ad   : > { %v2841_v54 = vadd.f32 %v3929_v33, %v2793_v23  ;;  %v3424_v12 = vld [vmem:[%s5999_s7 + $0x10] sm:$0xff] }
 0x2af   : > { %v2889_v42 = vadd.f32 %v5842_v26, %v2841_v54  ;;  %v3425_v54 = vld [vmem:[%s5999_s7 + $0x18] sm:$0xff] }
 0x2c1   : > { %v3977_v30 = vpop.f32.mrb[32].mxu1 }
 0x2c2   : > { %v3978_v32 = vpop.f32.mrb[33].mxu1 }
 0x2c3   : > { %v3979_v50 = vadd.f32 %v3978_v32, %v3977_v30  ;;  %v3980_v27 = vpop.f32.mrb[34].mxu1  ;;  %v3426_v30 = vld [vmem:[%s5999_s7 + $0x20] sm:$0xff]  ;;  %v3427_v32 = vld [vmem:[%s5999_s7 + $0x28] sm:$0xff] }
 0x2c4   : > { %v3981_v44 = vpop.f32.mrb[35].mxu1 }
 0x2c5   : > { %v2929_v41 = vadd.f32 %v3979_v50, %v2881_v58  ;;  %v3982_v17 = vadd.f32 %v3981_v44, %v3980_v27  ;;  %v3428_v50 = vld [vmem:[%s5999_s7 + $0x30] sm:$0xff]  ;;  %v4130_v27 = vpack.c.bf16 %v3427_v32, %v3426_v30  ;;  %v3429_v44 = vld [vmem:[%s5999_s7 + $0x38] sm:$0xff] }
 0x2c7   : > { %v2932_v59 = vadd.f32 %v3982_v17, %v2884_v5  ;;  %v2977_v0 = vadd.f32 %v4007_v53, %v2929_v41  ;;  %v6048_v41 = vmov 0.0   ;;  %v4133_v17 = vpack.c.bf16 %v3429_v44, %v3428_v50 }
 0x2c9   : > { %v3983_v31 = vpop.f32.mrb[36].mxu1  ;;  %v2980_v7 = vadd.f32 %v4010_v52, %v2932_v59 }
 0x2ca   : > { %v3984_v19 = vpop.f32.mrb[37].mxu1 }
 0x2cb   : > { %v3985_v56 = vadd.f32 %v3984_v19, %v3983_v31  ;;  %v3986_v34 = vpop.f32.mrb[38].mxu1 }
 0x2cc   : > { %v3987_v39 = vpop.f32.mrb[39].mxu1 }
 0x2cd   : > { %v2937_v15 = vadd.f32 %v3985_v56, %v2889_v42  ;;  %v4127_v42 = vpack.c.bf16 %v3425_v54, %v3424_v12  ;;  %v3148_v56 = vld [vmem:[%s5998_s6] sm:$0x1] }
 0x2cf   : > { %v2985_v14 = vadd.f32 %v4013_v37, %v2937_v15  ;;  %v3423_v37 = vld [vmem:[%s5999_s7 + $0x8] sm:$0xff] }
 0x2d0   : > { %v4124_v22 = vpack.c.bf16 %v3423_v37, %v3422_v36 }
 0x2e1   : > { %v4033_v13 = vpop.f32.mrb[40].mxu1 }
 0x2e2   : > { %v4034_v28 = vpop.f32.mrb[41].mxu1 }
 0x2e3   : > { %v4035_v26 = vadd.f32 %v4034_v28, %v4033_v13  ;;  %v4036_v16 = vpop.f32.mrb[42].mxu1 }
 0x2e4   : > { %v4037_v57 = vpop.f32.mrb[43].mxu1 }
 0x2e5   : > { %v3025_v1 = vadd.f32 %v4035_v26, %v2977_v0  ;;  %v4038_v61 = vadd.f32 %v4037_v57, %v4036_v16  ;;  %v3430_v16 = vld [vmem:[%s6000_s8] sm:$0x1] }
 0x2e7   : > { %v3038_v25 = vmax.f32 %v3025_v1, 0.0  ;;  %v3028_v60 = vadd.f32 %v4038_v61, %v2980_v7 }
 0x2e9   : > { %v3042_v62 = vrot.slane %v3038_v25, 1  ;;  %v3039_v9 = vmax.f32 %v3028_v60, 0.0  ;;  %v4039_v18 = vpop.f32.mrb[44].mxu1 }
 0x2ea   : > { %v4040_v48 = vpop.f32.mrb[45].mxu1 }
 0x2eb   : > { %v3044_v53 = vmax.f32 %v3038_v25, %v3042_v62  ;;  %v3050_v24 = vrot.slane %v3039_v9, 1  ;;  %v4041_v29 = vadd.f32 %v4040_v48, %v4039_v18  ;;  %v4042_v11 = vpop.f32.mrb[46].mxu1 }
 0x2ec   : > { %v4043_v35 = vpop.f32.mrb[47].mxu1 }
 0x2ed   : > { %v3033_v49 = vadd.f32 %v4041_v29, %v2985_v14  ;;  %v3052_v38 = vmax.f32 %v3038_v25, %v3050_v24  ;;  %v3046_v52 = vrot.slane %v3044_v53, 5  ;;  %v3057_v46 = vmax.f32 %v3039_v9, %v3050_v24 }
 0x2ef   : > { %v3040_v3 = vmax.f32 %v3033_v49, 0.0  ;;  %v3054_v40 = vrot.slane %v3052_v38, 5  ;;  %v3048_v47 = vmax.f32 %v3044_v53, %v3046_v52 }
 0x2f1   : > { %v3059_v10 = vrot.slane %v3040_v3, 1  ;;  %v3056_v23 = vmax.f32 %v3044_v53, %v3054_v40  ;;  %v3080_v21 = vpack.c.bf16 %v3048_v47, %v3048_v47 }
 0x2f3   : > { %v3061_v6 = vmax.f32 %v3039_v9, %v3059_v10  ;;  %v3066_v43 = vmax.f32 %v3040_v3, %v3059_v10  ;;  %v3072_v4 = vrot.slane %v3056_v23, 2 }
 0x2f5   : > { %v3063_v2 = vrot.slane %v3061_v6, 5  ;;  %v3068_v20 = vrot.slane %v3066_v43, 5  ;;  %v3081_v63 = vpack.c.bf16 %v3072_v4, %v3072_v4 }
 0x2f7   : > { %3373 = vmatprep.mubr.bf16.mxu0 %v3081_v63  ;;  %v3065_v58 = vmax.f32 %v3057_v46, %v3063_v2  ;;  %v3070_v45 = vmax.f32 %v3057_v46, %v3068_v20 }
 0x2f8   : > { %3374 = vmatmul.mubr.bf16.vlgmr.msra.gmra.mrb[80].mxu0 %v3080_v21 }
 0x2f9   : > { %v3075_v5 = vrot.slane %v3065_v58, 2  ;;  %v3078_v51 = vrot.slane %v3070_v45, 4  ;;  %4125 = vmatpush3.bf16.msra.mxu0 %v4124_v22  ;;  %4114 = vmatprep.mubr.msk.f32.mxu0 %vm4424_vm9, %v6048_v41 }
 0x2fa   : > { %4126 = vmatprep.subr.bf16.mxu0 %v4423_v55 }
 0x2fb   : > { %v3082_v33 = vpack.c.bf16 %v3075_v5, %v3075_v5  ;;  %v3083_v8 = vpack.c.bf16 %v3078_v51, %v3078_v51 }
 0x2fd   : > { %3413 = vmatprep.mubr.bf16.mxu1 %v3083_v8  ;;  %4128 = vmatpush3.bf16.msra.mxu0 %v4127_v42 }
 0x2fe   : > { %3414 = vmatmul.mubr.bf16.vlgmr.msra.gmra.mrb[48].mxu1 %v3082_v33  ;;  %4129 = vmatprep.subr.bf16.mxu0 %v4423_v55 }
 0x301   : > { %4131 = vmatpush3.bf16.msra.mxu0 %v4130_v27 }
 0x302   : > { %4132 = vmatprep.subr.bf16.mxu0 %v4423_v55 }
 0x305   : > { %4134 = vmatpush3.bf16.msra.mxu0 %v4133_v17 }
 0x3cb   : > { %v4061_v59 = vpop.f32.mrb[80].mxu0 }
 0x3cc   : > { %v4062_v0 = vpop.f32.mrb[81].mxu0 }
 0x3cd   : > { %v4063_v31 = vadd.f32 %v4062_v0, %v4061_v59  ;;  %v4064_v7 = vpop.f32.mrb[82].mxu0 }
 0x3ce   : > { %v4065_v19 = vpop.f32.mrb[83].mxu0 }
 0x3cf   : > { %v3376_v15 = vadd.f32 %v4063_v31, %v3148_v56 }
 0x3d1   : > { %v4083_v34 = vpop.f32.mrb[48].mxu1 }
 0x3d2   : > { %v4084_v39 = vpop.f32.mrb[49].mxu1 }
 0x3d3   : > { %v4085_v14 = vadd.f32 %v4084_v39, %v4083_v34  ;;  %v4086_v13 = vpop.f32.mrb[50].mxu1 }
 0x3d4   : > { %v4087_v28 = vpop.f32.mrb[51].mxu1 }
 0x3d5   : > { %v3416_v26 = vadd.f32 %v4085_v14, %v3376_v15 }
 0x3d7   : > { %v3421_v55 = vmax.f32 %v3416_v26, 0.0 }
 0x3d9   : > { %4115 = vmatmul.mubr.msk.f32.vlgmr.msra.gmra.mrb[84].mxu0 %vm3431_vm10, %v3421_v55 }
 0x4ac   : > { %v3501_v57 = vpop.f32.mrb[84].mxu0 }
 0x4ad   : > { %v3502_v1 = vadd.f32 %v3501_v57, %v3430_v16  ;;  %v4116_v61 = vpop.f32.mrb[85].mxu0 }
 0x4af   : > { %3506 = vst.msk [vmem:[%s324_s28] sm:$0x1] %vm3505_vm11, %v3502_v1 }
 0x4b0   : > { %4370 = shalt.err (!%p4367_p3)
}
 0x4b1   : > { %s4371_s24 = scalar_lea.hbm %s5950_s17, 16  ;;  %s4375_s28 = scalar_lea.hbm %s6001_s9, 32 }
 0x4b2   : > { %p4372_p4 = scmp.ne.s32.totalorder %s5950_s17, %s4371_s24  ;;  %p4376_p9 = scmp.lt.u32.totalorder %s5950_s17, %s6001_s9 }
 0x4b3   : > { %p4377_p10 = scmp.lt.u32.totalorder %s4375_s28, %s4371_s24  ;;  %p4379_p12 = scmp.lt.u32.totalorder %s4371_s24, %s5950_s17 }
 0x4b4   : > { %p4373_p7 = pnand %p4372_p4, %p4514_p5 }
 0x4b5   : > { %p4378_p11 = por %p4377_p10, %p4376_p9 }
 0x4b6   : > { %p4374_p8 = pneg %p4373_p7 }
 0x4b7   : > { %p4380_p13 = por %p4379_p12, %p4378_p11 }
 0x4b9   : > { %p4381_p0 = pnand %p4380_p13, %p4374_p8 }
 0x4bb   : > { %4384 = shalt.err (!%p4381_p0)
}
 0x4bc   : > { %4136 = dma.vmem_to_hbm [thread:$0]  (%p4514_p5), %s5952_s29, 16, %s5950_s17, %s3508_s21  }
 0x4bd PF: > { %p4142_p1 = scmp.ge.s32.totalorder %s4419_s12, 2  ;;  %s3532_s22 = sand.u32 1, %s4407_s30  }
 0x4be   : > { %s3533_s13 = scalar_lea.sflag [#allocation4], %s3532_s22 }
 0x4bf   : > { %p4139_p2 = pnand %p4142_p1, %p4518_p6 }
 0x4c1   : > { %4402 = dma.done.wait (!%p4139_p2), %s3533_s13, 16  }
 0x4c2   : > { %4404 = vsyncadd (!%p4139_p2), %s3533_s13, 4294967280  ;;  %p19_p3 = scmp.ge.s32.totalorder %s4501_s15, 4   ;;  %s6049_s30 = smov %s4411_s10 }
 0x4c3   : > { %s6050_s10 = smov %s4415_s11  ;;  %s6051_s11 = smov %s4512_s18 }
 0x4c4   : > { %s6052_s12 = smov %s4501_s15  ;;  %21 = sbr.rel (!%p19_p3) target bundleno = 3 (0x3), region = 91 }
 0x4cb   :  { %3537 = vsyncpa [#allocation4], 1 }
 0x4cc   :  { %3539 = vsyncpa [#allocation4 + $0x1], 1 }

</bundles_post_ra>
